<compile_context>
chip_gen: v7x
topology: tpu7x:2x2x1
jax: 0.10.0
libtpu: 0.0.40
codegen_flags: <defaults>
</compile_context>

<pallas_src>
import functools

import numpy as np
import jax
import jax.numpy as jnp
from jax.experimental import pallas as pl
from jax.experimental.pallas import tpu as pltpu

_EPS = 1e-5  # nn.BatchNorm1d default eps


def _make_sel(n, l_out, l_in, stride):
    """(3, n*l_out, n*l_in) 0/1 tap-selection matrices (host-side, static).

    Row b*l_out + j of tap k selects input row b*l_in + (stride*j + k - 1);
    out-of-range source positions (k=3, pad=1 'same' padding) give all-zero
    rows, i.e. exactly the zero-padding contribution.  Block-diagonal over the
    batch so samples never mix.  The gather then runs as a tiny MXU matmul.
    """
    sel = np.zeros((3, n * l_out, n * l_in), np.float32)
    for k in range(3):
        for b in range(n):
            for j in range(l_out):
                src = stride * j + k - 1
                if 0 <= src < l_in:
                    sel[k, b * l_out + j, b * l_in + src] = 1.0
    return sel


def _stem_kernel(meta, x_ref,
                 s1_ref, w1_ref, g1_ref, b1_ref,
                 s2_ref, w2_ref, g2_ref, b2_ref,
                 s3_ref, w3_ref, g3_ref, b3_ref,
                 s4_ref, w4_ref, g4_ref, b4_ref,
                 out_ref):
    n, layers = meta  # layers: tuple of (l_in, l_out, stride), static
    s_refs = (s1_ref, s2_ref, s3_ref, s4_ref)
    w_refs = (w1_ref, w2_ref, w3_ref, w4_ref)
    g_refs = (g1_ref, g2_ref, g3_ref, g4_ref)
    b_refs = (b1_ref, b2_ref, b3_ref, b4_ref)

    act = x_ref[...].astype(jnp.float32)            # (n*L0, Cin), VMEM resident

    for li, (l_in, l_out, stride) in enumerate(layers):
        del l_in, stride  # already folded into the selection matrices

        # --- Conv1d(k=3, p=1) as 3 (gather-matmul, weight-matmul) pairs ---
        y = None
        for k in range(3):
            gathered = jnp.dot(s_refs[li][k], act,
                               preferred_element_type=jnp.float32)
            term = jnp.dot(gathered, w_refs[li][k],
                           preferred_element_type=jnp.float32)
            y = term if y is None else y + term      # (n*l_out, Cout) f32

        # --- BatchNorm1d (train mode): biased stats over all N*L_out rows ---
        inv_cnt = 1.0 / float(n * l_out)
        mean = jnp.sum(y, axis=0, keepdims=True) * inv_cnt       # (1, Cout)
        d = y - mean
        var = jnp.sum(d * d, axis=0, keepdims=True) * inv_cnt    # (1, Cout)

        # Fold BN + affine into one scale/shift FMA; rsqrt -> EUP slot.
        scale = g_refs[li][...] * jax.lax.rsqrt(var + _EPS)
        shift = b_refs[li][...] - mean * scale

        # --- normalize + ReLU ---
        act = jnp.maximum(y * scale + shift, 0.0)

    out_ref[...] = act.astype(out_ref.dtype)


def stem_block(x_ncl, params):
    """x_ncl: (N, Cin, L); params: list of 4 (w (Cout,Cin,3), gamma, beta, stride)."""
    n, c_in, l = x_ncl.shape
    # NCL -> (N*L, C): batch folded into the row/sublane dim.
    x_flat = jnp.transpose(x_ncl, (0, 2, 1)).reshape(n * l, c_in).astype(jnp.float32)

    layers = []
    kernel_inputs = [x_flat]
    l_in = l
    for (w, gamma, beta, stride) in params:
        c_out = w.shape[0]
        l_out = (l_in + 2 * 1 - 3) // stride + 1
        layers.append((l_in, l_out, stride))
        kernel_inputs += [
            jnp.asarray(_make_sel(n, l_out, l_in, stride)),        # (3, R, C) 0/1
            jnp.transpose(w, (2, 1, 0)).astype(jnp.float32),       # (3, Cin, Cout)
            gamma.reshape(1, c_out).astype(jnp.float32),
            beta.reshape(1, c_out).astype(jnp.float32),
        ]
        l_in = l_out

    c_final = params[-1][0].shape[0]
    l_final = l_in

    def full_spec(a):
        nd = a.ndim
        return pl.BlockSpec(a.shape, lambda i, nd=nd: (0,) * nd)

    kernel = functools.partial(_stem_kernel, (n, tuple(layers)))

    out = pl.pallas_call(
        kernel,
        grid=(1,),
        in_specs=[full_spec(a) for a in kernel_inputs],
        out_specs=pl.BlockSpec((n * l_final, c_final), lambda i: (0, 0)),
        out_shape=jax.ShapeDtypeStruct((n * l_final, c_final), jnp.float32),
        compiler_params=pltpu.CompilerParams(
            dimension_semantics=("arbitrary",)),
    )(*kernel_inputs)

    out = out.reshape(n, l_final, c_final)
    return jnp.transpose(out, (0, 2, 1))  # -> NCL


def stem_block_ref(x_ncl, params):
    """Pure-JAX reference (lax conv + train-mode BN + ReLU)."""
    x = x_ncl.astype(jnp.float32)
    for (w, gamma, beta, stride) in params:
        y = jax.lax.conv_general_dilated(
            x, w.astype(jnp.float32), window_strides=(stride,),
            padding=((1, 1),), dimension_numbers=("NCH", "OIH", "NCH"))
        mean = jnp.mean(y, axis=(0, 2), keepdims=True)
        var = jnp.mean(jnp.square(y - mean), axis=(0, 2), keepdims=True)
        y = (y - mean) * jax.lax.rsqrt(var + _EPS)
        y = y * gamma.reshape(1, -1, 1) + beta.reshape(1, -1, 1)
        x = jnp.maximum(y, 0.0)
    return x


def init_stem_params(key, in_channels, out_channels):
    """Deterministic init mirroring the module: kaiming_normal_(fan_out, relu),
    BN weight=1, bias=0."""
    c_half = out_channels // 2
    layer_dims = [
        (in_channels, c_half, 2),
        (c_half, c_half, 1),
        (c_half, out_channels, 1),
        (out_channels, out_channels, 2),
    ]
    params = []
    for cin, cout, stride in layer_dims:
        key, sub = jax.random.split(key)
        fan_out = cout * 3                   # C_out * kernel_size
        std = (2.0 / fan_out) ** 0.5         # kaiming_normal, relu gain
        w = std * jax.random.normal(sub, (cout, cin, 3), dtype=jnp.float32)
        gamma = jnp.ones((cout,), jnp.float32)
        beta = jnp.zeros((cout,), jnp.float32)
        params.append((w, gamma, beta, stride))
    return params


if __name__ == "__main__":
    key = jax.random.PRNGKey(0)
    k_x, k_p = jax.random.split(key)

    N, C_in, L = 2, 4, 16
    C_out = 32
    x = jax.random.normal(k_x, (N, C_in, L), dtype=jnp.float32)
    params = init_stem_params(k_p, C_in, C_out)

    y = stem_block(x, params)
    jax.block_until_ready(y)

    # Two stride-2 convs with p=1, k=3: L 16 -> 8 -> 8 -> 8 -> 4
    assert y.shape == (N, C_out, L // 4), y.shape
    assert bool(jnp.all(y >= 0.0))  # ReLU output

    y_ref = stem_block_ref(x, params)
    err = float(jnp.max(jnp.abs(y - y_ref)))
    assert err < 2e-2, f"max abs error vs reference: {err}"

    print("KERNEL_OK")
</pallas_src>

<mosaic_0001>
module attributes {stable_mosaic.version = 11 : i64} {
  func.func @_stem_kernel(%arg0: i32, %arg1: memref<32x4xf32, #tpu.memory_space<vmem>>, %arg2: memref<3x16x32xf32, #tpu.memory_space<vmem>>, %arg3: memref<3x4x16xf32, #tpu.memory_space<vmem>>, %arg4: memref<1x16xf32, #tpu.memory_space<vmem>>, %arg5: memref<1x16xf32, #tpu.memory_space<vmem>>, %arg6: memref<3x16x16xf32, #tpu.memory_space<vmem>>, %arg7: memref<3x16x16xf32, #tpu.memory_space<vmem>>, %arg8: memref<1x16xf32, #tpu.memory_space<vmem>>, %arg9: memref<1x16xf32, #tpu.memory_space<vmem>>, %arg10: memref<3x16x16xf32, #tpu.memory_space<vmem>>, %arg11: memref<3x16x32xf32, #tpu.memory_space<vmem>>, %arg12: memref<1x32xf32, #tpu.memory_space<vmem>>, %arg13: memref<1x32xf32, #tpu.memory_space<vmem>>, %arg14: memref<3x8x16xf32, #tpu.memory_space<vmem>>, %arg15: memref<3x32x32xf32, #tpu.memory_space<vmem>>, %arg16: memref<1x32xf32, #tpu.memory_space<vmem>>, %arg17: memref<1x32xf32, #tpu.memory_space<vmem>>, %arg18: memref<8x32xf32, #tpu.memory_space<vmem>>) attributes {dimension_semantics = [#tpu.dimension_semantics<arbitrary>], iteration_bounds = array<i64: 1>, scalar_prefetch = 0 : i64, scratch_operands = 0 : i64, tpu.core_type = #tpu.core_type<tc>, window_params = [{pipeline_mode = #tpu.pipeline_mode<synchronous>, transform_indices = @transform_0, window_bounds = array<i64: 32, 4>}, {pipeline_mode = #tpu.pipeline_mode<synchronous>, transform_indices = @transform_1, window_bounds = array<i64: 3, 16, 32>}, {pipeline_mode = #tpu.pipeline_mode<synchronous>, transform_indices = @transform_2, window_bounds = array<i64: 3, 4, 16>}, {pipeline_mode = #tpu.pipeline_mode<synchronous>, transform_indices = @transform_3, window_bounds = array<i64: 1, 16>}, {pipeline_mode = #tpu.pipeline_mode<synchronous>, transform_indices = @transform_4, window_bounds = array<i64: 1, 16>}, {pipeline_mode = #tpu.pipeline_mode<synchronous>, transform_indices = @transform_5, window_bounds = array<i64: 3, 16, 16>}, {pipeline_mode = #tpu.pipeline_mode<synchronous>, transform_indices = @transform_6, window_bounds = array<i64: 3, 16, 16>}, {pipeline_mode = #tpu.pipeline_mode<synchronous>, transform_indices = @transform_7, window_bounds = array<i64: 1, 16>}, {pipeline_mode = #tpu.pipeline_mode<synchronous>, transform_indices = @transform_8, window_bounds = array<i64: 1, 16>}, {pipeline_mode = #tpu.pipeline_mode<synchronous>, transform_indices = @transform_9, window_bounds = array<i64: 3, 16, 16>}, {pipeline_mode = #tpu.pipeline_mode<synchronous>, transform_indices = @transform_10, window_bounds = array<i64: 3, 16, 32>}, {pipeline_mode = #tpu.pipeline_mode<synchronous>, transform_indices = @transform_11, window_bounds = array<i64: 1, 32>}, {pipeline_mode = #tpu.pipeline_mode<synchronous>, transform_indices = @transform_12, window_bounds = array<i64: 1, 32>}, {pipeline_mode = #tpu.pipeline_mode<synchronous>, transform_indices = @transform_13, window_bounds = array<i64: 3, 8, 16>}, {pipeline_mode = #tpu.pipeline_mode<synchronous>, transform_indices = @transform_14, window_bounds = array<i64: 3, 32, 32>}, {pipeline_mode = #tpu.pipeline_mode<synchronous>, transform_indices = @transform_15, window_bounds = array<i64: 1, 32>}, {pipeline_mode = #tpu.pipeline_mode<synchronous>, transform_indices = @transform_16, window_bounds = array<i64: 1, 32>}, {pipeline_mode = #tpu.pipeline_mode<synchronous>, transform_indices = @transform_17, window_bounds = array<i64: 8, 32>}]} {
    %c0 = arith.constant 0 : index
    %c0_0 = arith.constant 0 : index
    %0 = vector.load %arg1[%c0, %c0_0] : memref<32x4xf32, #tpu.memory_space<vmem>>, vector<32x4xf32>
    %c0_1 = arith.constant 0 : index
    %c0_2 = arith.constant 0 : index
    %c0_3 = arith.constant 0 : index
    %1 = vector.load %arg2[%c0_1, %c0_2, %c0_3] : memref<3x16x32xf32, #tpu.memory_space<vmem>>, vector<1x16x32xf32>
    %2 = vector.shape_cast %1 : vector<1x16x32xf32> to vector<16x32xf32>
    %cst = arith.constant dense<0.000000e+00> : vector<16x4xf32>
    %3 = tpu.matmul %2, %0, %cst {dimension_numbers = #tpu.dot_dimension_numbers<[1], [0], [0], [1], [0, 0, 1, 1], [], []>} : vector<16x32xf32>, vector<32x4xf32>, vector<16x4xf32> -> vector<16x4xf32>
    %c0_4 = arith.constant 0 : index
    %c0_5 = arith.constant 0 : index
    %c0_6 = arith.constant 0 : index
    %4 = vector.load %arg3[%c0_4, %c0_5, %c0_6] : memref<3x4x16xf32, #tpu.memory_space<vmem>>, vector<1x4x16xf32>
    %5 = vector.shape_cast %4 : vector<1x4x16xf32> to vector<4x16xf32>
    %cst_7 = arith.constant dense<0.000000e+00> : vector<16x16xf32>
    %6 = tpu.matmul %3, %5, %cst_7 {dimension_numbers = #tpu.dot_dimension_numbers<[1], [0], [0], [1], [0, 0, 1, 1], [], []>} : vector<16x4xf32>, vector<4x16xf32>, vector<16x16xf32> -> vector<16x16xf32>
    %c1 = arith.constant 1 : index
    %c0_8 = arith.constant 0 : index
    %c0_9 = arith.constant 0 : index
    %7 = vector.load %arg2[%c1, %c0_8, %c0_9] : memref<3x16x32xf32, #tpu.memory_space<vmem>>, vector<1x16x32xf32>
    %8 = vector.shape_cast %7 : vector<1x16x32xf32> to vector<16x32xf32>
    %cst_10 = arith.constant dense<0.000000e+00> : vector<16x4xf32>
    %9 = tpu.matmul %8, %0, %cst_10 {dimension_numbers = #tpu.dot_dimension_numbers<[1], [0], [0], [1], [0, 0, 1, 1], [], []>} : vector<16x32xf32>, vector<32x4xf32>, vector<16x4xf32> -> vector<16x4xf32>
    %c1_11 = arith.constant 1 : index
    %c0_12 = arith.constant 0 : index
    %c0_13 = arith.constant 0 : index
    %10 = vector.load %arg3[%c1_11, %c0_12, %c0_13] : memref<3x4x16xf32, #tpu.memory_space<vmem>>, vector<1x4x16xf32>
    %11 = vector.shape_cast %10 : vector<1x4x16xf32> to vector<4x16xf32>
    %cst_14 = arith.constant dense<0.000000e+00> : vector<16x16xf32>
    %12 = tpu.matmul %9, %11, %cst_14 {dimension_numbers = #tpu.dot_dimension_numbers<[1], [0], [0], [1], [0, 0, 1, 1], [], []>} : vector<16x4xf32>, vector<4x16xf32>, vector<16x16xf32> -> vector<16x16xf32>
    %13 = arith.addf %6, %12 : vector<16x16xf32>
    %c2 = arith.constant 2 : index
    %c0_15 = arith.constant 0 : index
    %c0_16 = arith.constant 0 : index
    %14 = vector.load %arg2[%c2, %c0_15, %c0_16] : memref<3x16x32xf32, #tpu.memory_space<vmem>>, vector<1x16x32xf32>
    %15 = vector.shape_cast %14 : vector<1x16x32xf32> to vector<16x32xf32>
    %cst_17 = arith.constant dense<0.000000e+00> : vector<16x4xf32>
    %16 = tpu.matmul %15, %0, %cst_17 {dimension_numbers = #tpu.dot_dimension_numbers<[1], [0], [0], [1], [0, 0, 1, 1], [], []>} : vector<16x32xf32>, vector<32x4xf32>, vector<16x4xf32> -> vector<16x4xf32>
    %c2_18 = arith.constant 2 : index
    %c0_19 = arith.constant 0 : index
    %c0_20 = arith.constant 0 : index
    %17 = vector.load %arg3[%c2_18, %c0_19, %c0_20] : memref<3x4x16xf32, #tpu.memory_space<vmem>>, vector<1x4x16xf32>
    %18 = vector.shape_cast %17 : vector<1x4x16xf32> to vector<4x16xf32>
    %cst_21 = arith.constant dense<0.000000e+00> : vector<16x16xf32>
    %19 = tpu.matmul %16, %18, %cst_21 {dimension_numbers = #tpu.dot_dimension_numbers<[1], [0], [0], [1], [0, 0, 1, 1], [], []>} : vector<16x4xf32>, vector<4x16xf32>, vector<16x16xf32> -> vector<16x16xf32>
    %20 = arith.addf %13, %19 : vector<16x16xf32>
    %cst_22 = arith.constant dense<0.000000e+00> : vector<16xf32>
    %21 = vector.multi_reduction <add>, %20, %cst_22 [0] : vector<16x16xf32> to vector<16xf32>
    %22 = vector.shape_cast %21 : vector<16xf32> to vector<1x16xf32>
    %cst_23 = arith.constant 6.250000e-02 : f32
    %23 = vector.broadcast %cst_23 : f32 to vector<1x16xf32>
    %24 = arith.mulf %22, %23 : vector<1x16xf32>
    %25 = vector.broadcast %24 : vector<1x16xf32> to vector<16x16xf32>
    %26 = arith.subf %20, %25 : vector<16x16xf32>
    %27 = arith.mulf %26, %26 : vector<16x16xf32>
    %cst_24 = arith.constant dense<0.000000e+00> : vector<16xf32>
    %28 = vector.multi_reduction <add>, %27, %cst_24 [0] : vector<16x16xf32> to vector<16xf32>
    %29 = vector.shape_cast %28 : vector<16xf32> to vector<1x16xf32>
    %cst_25 = arith.constant 6.250000e-02 : f32
    %30 = vector.broadcast %cst_25 : f32 to vector<1x16xf32>
    %31 = arith.mulf %29, %30 : vector<1x16xf32>
    %c0_26 = arith.constant 0 : index
    %c0_27 = arith.constant 0 : index
    %32 = vector.load %arg4[%c0_26, %c0_27] : memref<1x16xf32, #tpu.memory_space<vmem>>, vector<1x16xf32>
    %cst_28 = arith.constant 9.99999974E-6 : f32
    %33 = vector.broadcast %cst_28 : f32 to vector<1x16xf32>
    %34 = arith.addf %31, %33 : vector<1x16xf32>
    %35 = math.rsqrt %34 : vector<1x16xf32>
    %36 = arith.mulf %32, %35 : vector<1x16xf32>
    %c0_29 = arith.constant 0 : index
    %c0_30 = arith.constant 0 : index
    %37 = vector.load %arg5[%c0_29, %c0_30] : memref<1x16xf32, #tpu.memory_space<vmem>>, vector<1x16xf32>
    %38 = arith.mulf %24, %36 : vector<1x16xf32>
    %39 = arith.subf %37, %38 : vector<1x16xf32>
    %40 = vector.broadcast %36 : vector<1x16xf32> to vector<16x16xf32>
    %41 = arith.mulf %20, %40 : vector<16x16xf32>
    %42 = vector.broadcast %39 : vector<1x16xf32> to vector<16x16xf32>
    %43 = arith.addf %41, %42 : vector<16x16xf32>
    %cst_31 = arith.constant 0.000000e+00 : f32
    %44 = vector.broadcast %cst_31 : f32 to vector<16x16xf32>
    %45 = arith.maximumf %43, %44 : vector<16x16xf32>
    %c0_32 = arith.constant 0 : index
    %c0_33 = arith.constant 0 : index
    %c0_34 = arith.constant 0 : index
    %46 = vector.load %arg6[%c0_32, %c0_33, %c0_34] : memref<3x16x16xf32, #tpu.memory_space<vmem>>, vector<1x16x16xf32>
    %47 = vector.shape_cast %46 : vector<1x16x16xf32> to vector<16x16xf32>
    %cst_35 = arith.constant dense<0.000000e+00> : vector<16x16xf32>
    %48 = tpu.matmul %47, %45, %cst_35 {dimension_numbers = #tpu.dot_dimension_numbers<[1], [0], [0], [1], [0, 0, 1, 1], [], []>} : vector<16x16xf32>, vector<16x16xf32>, vector<16x16xf32> -> vector<16x16xf32>
    %c0_36 = arith.constant 0 : index
    %c0_37 = arith.constant 0 : index
    %c0_38 = arith.constant 0 : index
    %49 = vector.load %arg7[%c0_36, %c0_37, %c0_38] : memref<3x16x16xf32, #tpu.memory_space<vmem>>, vector<1x16x16xf32>
    %50 = vector.shape_cast %49 : vector<1x16x16xf32> to vector<16x16xf32>
    %cst_39 = arith.constant dense<0.000000e+00> : vector<16x16xf32>
    %51 = tpu.matmul %48, %50, %cst_39 {dimension_numbers = #tpu.dot_dimension_numbers<[1], [0], [0], [1], [0, 0, 1, 1], [], []>} : vector<16x16xf32>, vector<16x16xf32>, vector<16x16xf32> -> vector<16x16xf32>
    %c1_40 = arith.constant 1 : index
    %c0_41 = arith.constant 0 : index
    %c0_42 = arith.constant 0 : index
    %52 = vector.load %arg6[%c1_40, %c0_41, %c0_42] : memref<3x16x16xf32, #tpu.memory_space<vmem>>, vector<1x16x16xf32>
    %53 = vector.shape_cast %52 : vector<1x16x16xf32> to vector<16x16xf32>
    %cst_43 = arith.constant dense<0.000000e+00> : vector<16x16xf32>
    %54 = tpu.matmul %53, %45, %cst_43 {dimension_numbers = #tpu.dot_dimension_numbers<[1], [0], [0], [1], [0, 0, 1, 1], [], []>} : vector<16x16xf32>, vector<16x16xf32>, vector<16x16xf32> -> vector<16x16xf32>
    %c1_44 = arith.constant 1 : index
    %c0_45 = arith.constant 0 : index
    %c0_46 = arith.constant 0 : index
    %55 = vector.load %arg7[%c1_44, %c0_45, %c0_46] : memref<3x16x16xf32, #tpu.memory_space<vmem>>, vector<1x16x16xf32>
    %56 = vector.shape_cast %55 : vector<1x16x16xf32> to vector<16x16xf32>
    %cst_47 = arith.constant dense<0.000000e+00> : vector<16x16xf32>
    %57 = tpu.matmul %54, %56, %cst_47 {dimension_numbers = #tpu.dot_dimension_numbers<[1], [0], [0], [1], [0, 0, 1, 1], [], []>} : vector<16x16xf32>, vector<16x16xf32>, vector<16x16xf32> -> vector<16x16xf32>
    %58 = arith.addf %51, %57 : vector<16x16xf32>
    %c2_48 = arith.constant 2 : index
    %c0_49 = arith.constant 0 : index
    %c0_50 = arith.constant 0 : index
    %59 = vector.load %arg6[%c2_48, %c0_49, %c0_50] : memref<3x16x16xf32, #tpu.memory_space<vmem>>, vector<1x16x16xf32>
    %60 = vector.shape_cast %59 : vector<1x16x16xf32> to vector<16x16xf32>
    %cst_51 = arith.constant dense<0.000000e+00> : vector<16x16xf32>
    %61 = tpu.matmul %60, %45, %cst_51 {dimension_numbers = #tpu.dot_dimension_numbers<[1], [0], [0], [1], [0, 0, 1, 1], [], []>} : vector<16x16xf32>, vector<16x16xf32>, vector<16x16xf32> -> vector<16x16xf32>
    %c2_52 = arith.constant 2 : index
    %c0_53 = arith.constant 0 : index
    %c0_54 = arith.constant 0 : index
    %62 = vector.load %arg7[%c2_52, %c0_53, %c0_54] : memref<3x16x16xf32, #tpu.memory_space<vmem>>, vector<1x16x16xf32>
    %63 = vector.shape_cast %62 : vector<1x16x16xf32> to vector<16x16xf32>
    %cst_55 = arith.constant dense<0.000000e+00> : vector<16x16xf32>
    %64 = tpu.matmul %61, %63, %cst_55 {dimension_numbers = #tpu.dot_dimension_numbers<[1], [0], [0], [1], [0, 0, 1, 1], [], []>} : vector<16x16xf32>, vector<16x16xf32>, vector<16x16xf32> -> vector<16x16xf32>
    %65 = arith.addf %58, %64 : vector<16x16xf32>
    %cst_56 = arith.constant dense<0.000000e+00> : vector<16xf32>
    %66 = vector.multi_reduction <add>, %65, %cst_56 [0] : vector<16x16xf32> to vector<16xf32>
    %67 = vector.shape_cast %66 : vector<16xf32> to vector<1x16xf32>
    %cst_57 = arith.constant 6.250000e-02 : f32
    %68 = vector.broadcast %cst_57 : f32 to vector<1x16xf32>
    %69 = arith.mulf %67, %68 : vector<1x16xf32>
    %70 = vector.broadcast %69 : vector<1x16xf32> to vector<16x16xf32>
    %71 = arith.subf %65, %70 : vector<16x16xf32>
    %72 = arith.mulf %71, %71 : vector<16x16xf32>
    %cst_58 = arith.constant dense<0.000000e+00> : vector<16xf32>
    %73 = vector.multi_reduction <add>, %72, %cst_58 [0] : vector<16x16xf32> to vector<16xf32>
    %74 = vector.shape_cast %73 : vector<16xf32> to vector<1x16xf32>
    %cst_59 = arith.constant 6.250000e-02 : f32
    %75 = vector.broadcast %cst_59 : f32 to vector<1x16xf32>
    %76 = arith.mulf %74, %75 : vector<1x16xf32>
    %c0_60 = arith.constant 0 : index
    %c0_61 = arith.constant 0 : index
    %77 = vector.load %arg8[%c0_60, %c0_61] : memref<1x16xf32, #tpu.memory_space<vmem>>, vector<1x16xf32>
    %cst_62 = arith.constant 9.99999974E-6 : f32
    %78 = vector.broadcast %cst_62 : f32 to vector<1x16xf32>
    %79 = arith.addf %76, %78 : vector<1x16xf32>
    %80 = math.rsqrt %79 : vector<1x16xf32>
    %81 = arith.mulf %77, %80 : vector<1x16xf32>
    %c0_63 = arith.constant 0 : index
    %c0_64 = arith.constant 0 : index
    %82 = vector.load %arg9[%c0_63, %c0_64] : memref<1x16xf32, #tpu.memory_space<vmem>>, vector<1x16xf32>
    %83 = arith.mulf %69, %81 : vector<1x16xf32>
    %84 = arith.subf %82, %83 : vector<1x16xf32>
    %85 = vector.broadcast %81 : vector<1x16xf32> to vector<16x16xf32>
    %86 = arith.mulf %65, %85 : vector<16x16xf32>
    %87 = vector.broadcast %84 : vector<1x16xf32> to vector<16x16xf32>
    %88 = arith.addf %86, %87 : vector<16x16xf32>
    %cst_65 = arith.constant 0.000000e+00 : f32
    %89 = vector.broadcast %cst_65 : f32 to vector<16x16xf32>
    %90 = arith.maximumf %88, %89 : vector<16x16xf32>
    %c0_66 = arith.constant 0 : index
    %c0_67 = arith.constant 0 : index
    %c0_68 = arith.constant 0 : index
    %91 = vector.load %arg10[%c0_66, %c0_67, %c0_68] : memref<3x16x16xf32, #tpu.memory_space<vmem>>, vector<1x16x16xf32>
    %92 = vector.shape_cast %91 : vector<1x16x16xf32> to vector<16x16xf32>
    %cst_69 = arith.constant dense<0.000000e+00> : vector<16x16xf32>
    %93 = tpu.matmul %92, %90, %cst_69 {dimension_numbers = #tpu.dot_dimension_numbers<[1], [0], [0], [1], [0, 0, 1, 1], [], []>} : vector<16x16xf32>, vector<16x16xf32>, vector<16x16xf32> -> vector<16x16xf32>
    %c0_70 = arith.constant 0 : index
    %c0_71 = arith.constant 0 : index
    %c0_72 = arith.constant 0 : index
    %94 = vector.load %arg11[%c0_70, %c0_71, %c0_72] : memref<3x16x32xf32, #tpu.memory_space<vmem>>, vector<1x16x32xf32>
    %95 = vector.shape_cast %94 : vector<1x16x32xf32> to vector<16x32xf32>
    %cst_73 = arith.constant dense<0.000000e+00> : vector<16x32xf32>
    %96 = tpu.matmul %93, %95, %cst_73 {dimension_numbers = #tpu.dot_dimension_numbers<[1], [0], [0], [1], [0, 0, 1, 1], [], []>} : vector<16x16xf32>, vector<16x32xf32>, vector<16x32xf32> -> vector<16x32xf32>
    %c1_74 = arith.constant 1 : index
    %c0_75 = arith.constant 0 : index
    %c0_76 = arith.constant 0 : index
    %97 = vector.load %arg10[%c1_74, %c0_75, %c0_76] : memref<3x16x16xf32, #tpu.memory_space<vmem>>, vector<1x16x16xf32>
    %98 = vector.shape_cast %97 : vector<1x16x16xf32> to vector<16x16xf32>
    %cst_77 = arith.constant dense<0.000000e+00> : vector<16x16xf32>
    %99 = tpu.matmul %98, %90, %cst_77 {dimension_numbers = #tpu.dot_dimension_numbers<[1], [0], [0], [1], [0, 0, 1, 1], [], []>} : vector<16x16xf32>, vector<16x16xf32>, vector<16x16xf32> -> vector<16x16xf32>
    %c1_78 = arith.constant 1 : index
    %c0_79 = arith.constant 0 : index
    %c0_80 = arith.constant 0 : index
    %100 = vector.load %arg11[%c1_78, %c0_79, %c0_80] : memref<3x16x32xf32, #tpu.memory_space<vmem>>, vector<1x16x32xf32>
    %101 = vector.shape_cast %100 : vector<1x16x32xf32> to vector<16x32xf32>
    %cst_81 = arith.constant dense<0.000000e+00> : vector<16x32xf32>
    %102 = tpu.matmul %99, %101, %cst_81 {dimension_numbers = #tpu.dot_dimension_numbers<[1], [0], [0], [1], [0, 0, 1, 1], [], []>} : vector<16x16xf32>, vector<16x32xf32>, vector<16x32xf32> -> vector<16x32xf32>
    %103 = arith.addf %96, %102 : vector<16x32xf32>
    %c2_82 = arith.constant 2 : index
    %c0_83 = arith.constant 0 : index
    %c0_84 = arith.constant 0 : index
    %104 = vector.load %arg10[%c2_82, %c0_83, %c0_84] : memref<3x16x16xf32, #tpu.memory_space<vmem>>, vector<1x16x16xf32>
    %105 = vector.shape_cast %104 : vector<1x16x16xf32> to vector<16x16xf32>
    %cst_85 = arith.constant dense<0.000000e+00> : vector<16x16xf32>
    %106 = tpu.matmul %105, %90, %cst_85 {dimension_numbers = #tpu.dot_dimension_numbers<[1], [0], [0], [1], [0, 0, 1, 1], [], []>} : vector<16x16xf32>, vector<16x16xf32>, vector<16x16xf32> -> vector<16x16xf32>
    %c2_86 = arith.constant 2 : index
    %c0_87 = arith.constant 0 : index
    %c0_88 = arith.constant 0 : index
    %107 = vector.load %arg11[%c2_86, %c0_87, %c0_88] : memref<3x16x32xf32, #tpu.memory_space<vmem>>, vector<1x16x32xf32>
    %108 = vector.shape_cast %107 : vector<1x16x32xf32> to vector<16x32xf32>
    %cst_89 = arith.constant dense<0.000000e+00> : vector<16x32xf32>
    %109 = tpu.matmul %106, %108, %cst_89 {dimension_numbers = #tpu.dot_dimension_numbers<[1], [0], [0], [1], [0, 0, 1, 1], [], []>} : vector<16x16xf32>, vector<16x32xf32>, vector<16x32xf32> -> vector<16x32xf32>
    %110 = arith.addf %103, %109 : vector<16x32xf32>
    %cst_90 = arith.constant dense<0.000000e+00> : vector<32xf32>
    %111 = vector.multi_reduction <add>, %110, %cst_90 [0] : vector<16x32xf32> to vector<32xf32>
    %112 = vector.shape_cast %111 : vector<32xf32> to vector<1x32xf32>
    %cst_91 = arith.constant 6.250000e-02 : f32
    %113 = vector.broadcast %cst_91 : f32 to vector<1x32xf32>
    %114 = arith.mulf %112, %113 : vector<1x32xf32>
    %115 = vector.broadcast %114 : vector<1x32xf32> to vector<16x32xf32>
    %116 = arith.subf %110, %115 : vector<16x32xf32>
    %117 = arith.mulf %116, %116 : vector<16x32xf32>
    %cst_92 = arith.constant dense<0.000000e+00> : vector<32xf32>
    %118 = vector.multi_reduction <add>, %117, %cst_92 [0] : vector<16x32xf32> to vector<32xf32>
    %119 = vector.shape_cast %118 : vector<32xf32> to vector<1x32xf32>
    %cst_93 = arith.constant 6.250000e-02 : f32
    %120 = vector.broadcast %cst_93 : f32 to vector<1x32xf32>
    %121 = arith.mulf %119, %120 : vector<1x32xf32>
    %c0_94 = arith.constant 0 : index
    %c0_95 = arith.constant 0 : index
    %122 = vector.load %arg12[%c0_94, %c0_95] : memref<1x32xf32, #tpu.memory_space<vmem>>, vector<1x32xf32>
    %cst_96 = arith.constant 9.99999974E-6 : f32
    %123 = vector.broadcast %cst_96 : f32 to vector<1x32xf32>
    %124 = arith.addf %121, %123 : vector<1x32xf32>
    %125 = math.rsqrt %124 : vector<1x32xf32>
    %126 = arith.mulf %122, %125 : vector<1x32xf32>
    %c0_97 = arith.constant 0 : index
    %c0_98 = arith.constant 0 : index
    %127 = vector.load %arg13[%c0_97, %c0_98] : memref<1x32xf32, #tpu.memory_space<vmem>>, vector<1x32xf32>
    %128 = arith.mulf %114, %126 : vector<1x32xf32>
    %129 = arith.subf %127, %128 : vector<1x32xf32>
    %130 = vector.broadcast %126 : vector<1x32xf32> to vector<16x32xf32>
    %131 = arith.mulf %110, %130 : vector<16x32xf32>
    %132 = vector.broadcast %129 : vector<1x32xf32> to vector<16x32xf32>
    %133 = arith.addf %131, %132 : vector<16x32xf32>
    %cst_99 = arith.constant 0.000000e+00 : f32
    %134 = vector.broadcast %cst_99 : f32 to vector<16x32xf32>
    %135 = arith.maximumf %133, %134 : vector<16x32xf32>
    %c0_100 = arith.constant 0 : index
    %c0_101 = arith.constant 0 : index
    %c0_102 = arith.constant 0 : index
    %136 = vector.load %arg14[%c0_100, %c0_101, %c0_102] : memref<3x8x16xf32, #tpu.memory_space<vmem>>, vector<1x8x16xf32>
    %137 = vector.shape_cast %136 : vector<1x8x16xf32> to vector<8x16xf32>
    %cst_103 = arith.constant dense<0.000000e+00> : vector<8x32xf32>
    %138 = tpu.matmul %137, %135, %cst_103 {dimension_numbers = #tpu.dot_dimension_numbers<[1], [0], [0], [1], [0, 0, 1, 1], [], []>} : vector<8x16xf32>, vector<16x32xf32>, vector<8x32xf32> -> vector<8x32xf32>
    %c0_104 = arith.constant 0 : index
    %c0_105 = arith.constant 0 : index
    %c0_106 = arith.constant 0 : index
    %139 = vector.load %arg15[%c0_104, %c0_105, %c0_106] : memref<3x32x32xf32, #tpu.memory_space<vmem>>, vector<1x32x32xf32>
    %140 = vector.shape_cast %139 : vector<1x32x32xf32> to vector<32x32xf32>
    %cst_107 = arith.constant dense<0.000000e+00> : vector<8x32xf32>
    %141 = tpu.matmul %138, %140, %cst_107 {dimension_numbers = #tpu.dot_dimension_numbers<[1], [0], [0], [1], [0, 0, 1, 1], [], []>} : vector<8x32xf32>, vector<32x32xf32>, vector<8x32xf32> -> vector<8x32xf32>
    %c1_108 = arith.constant 1 : index
    %c0_109 = arith.constant 0 : index
    %c0_110 = arith.constant 0 : index
    %142 = vector.load %arg14[%c1_108, %c0_109, %c0_110] : memref<3x8x16xf32, #tpu.memory_space<vmem>>, vector<1x8x16xf32>
    %143 = vector.shape_cast %142 : vector<1x8x16xf32> to vector<8x16xf32>
    %cst_111 = arith.constant dense<0.000000e+00> : vector<8x32xf32>
    %144 = tpu.matmul %143, %135, %cst_111 {dimension_numbers = #tpu.dot_dimension_numbers<[1], [0], [0], [1], [0, 0, 1, 1], [], []>} : vector<8x16xf32>, vector<16x32xf32>, vector<8x32xf32> -> vector<8x32xf32>
    %c1_112 = arith.constant 1 : index
    %c0_113 = arith.constant 0 : index
    %c0_114 = arith.constant 0 : index
    %145 = vector.load %arg15[%c1_112, %c0_113, %c0_114] : memref<3x32x32xf32, #tpu.memory_space<vmem>>, vector<1x32x32xf32>
    %146 = vector.shape_cast %145 : vector<1x32x32xf32> to vector<32x32xf32>
    %cst_115 = arith.constant dense<0.000000e+00> : vector<8x32xf32>
    %147 = tpu.matmul %144, %146, %cst_115 {dimension_numbers = #tpu.dot_dimension_numbers<[1], [0], [0], [1], [0, 0, 1, 1], [], []>} : vector<8x32xf32>, vector<32x32xf32>, vector<8x32xf32> -> vector<8x32xf32>
    %148 = arith.addf %141, %147 : vector<8x32xf32>
    %c2_116 = arith.constant 2 : index
    %c0_117 = arith.constant 0 : index
    %c0_118 = arith.constant 0 : index
    %149 = vector.load %arg14[%c2_116, %c0_117, %c0_118] : memref<3x8x16xf32, #tpu.memory_space<vmem>>, vector<1x8x16xf32>
    %150 = vector.shape_cast %149 : vector<1x8x16xf32> to vector<8x16xf32>
    %cst_119 = arith.constant dense<0.000000e+00> : vector<8x32xf32>
    %151 = tpu.matmul %150, %135, %cst_119 {dimension_numbers = #tpu.dot_dimension_numbers<[1], [0], [0], [1], [0, 0, 1, 1], [], []>} : vector<8x16xf32>, vector<16x32xf32>, vector<8x32xf32> -> vector<8x32xf32>
    %c2_120 = arith.constant 2 : index
    %c0_121 = arith.constant 0 : index
    %c0_122 = arith.constant 0 : index
    %152 = vector.load %arg15[%c2_120, %c0_121, %c0_122] : memref<3x32x32xf32, #tpu.memory_space<vmem>>, vector<1x32x32xf32>
    %153 = vector.shape_cast %152 : vector<1x32x32xf32> to vector<32x32xf32>
    %cst_123 = arith.constant dense<0.000000e+00> : vector<8x32xf32>
    %154 = tpu.matmul %151, %153, %cst_123 {dimension_numbers = #tpu.dot_dimension_numbers<[1], [0], [0], [1], [0, 0, 1, 1], [], []>} : vector<8x32xf32>, vector<32x32xf32>, vector<8x32xf32> -> vector<8x32xf32>
    %155 = arith.addf %148, %154 : vector<8x32xf32>
    %cst_124 = arith.constant dense<0.000000e+00> : vector<32xf32>
    %156 = vector.multi_reduction <add>, %155, %cst_124 [0] : vector<8x32xf32> to vector<32xf32>
    %157 = vector.shape_cast %156 : vector<32xf32> to vector<1x32xf32>
    %cst_125 = arith.constant 1.250000e-01 : f32
    %158 = vector.broadcast %cst_125 : f32 to vector<1x32xf32>
    %159 = arith.mulf %157, %158 : vector<1x32xf32>
    %160 = vector.broadcast %159 : vector<1x32xf32> to vector<8x32xf32>
    %161 = arith.subf %155, %160 : vector<8x32xf32>
    %162 = arith.mulf %161, %161 : vector<8x32xf32>
    %cst_126 = arith.constant dense<0.000000e+00> : vector<32xf32>
    %163 = vector.multi_reduction <add>, %162, %cst_126 [0] : vector<8x32xf32> to vector<32xf32>
    %164 = vector.shape_cast %163 : vector<32xf32> to vector<1x32xf32>
    %cst_127 = arith.constant 1.250000e-01 : f32
    %165 = vector.broadcast %cst_127 : f32 to vector<1x32xf32>
    %166 = arith.mulf %164, %165 : vector<1x32xf32>
    %c0_128 = arith.constant 0 : index
    %c0_129 = arith.constant 0 : index
    %167 = vector.load %arg16[%c0_128, %c0_129] : memref<1x32xf32, #tpu.memory_space<vmem>>, vector<1x32xf32>
    %cst_130 = arith.constant 9.99999974E-6 : f32
    %168 = vector.broadcast %cst_130 : f32 to vector<1x32xf32>
    %169 = arith.addf %166, %168 : vector<1x32xf32>
    %170 = math.rsqrt %169 : vector<1x32xf32>
    %171 = arith.mulf %167, %170 : vector<1x32xf32>
    %c0_131 = arith.constant 0 : index
    %c0_132 = arith.constant 0 : index
    %172 = vector.load %arg17[%c0_131, %c0_132] : memref<1x32xf32, #tpu.memory_space<vmem>>, vector<1x32xf32>
    %173 = arith.mulf %159, %171 : vector<1x32xf32>
    %174 = arith.subf %172, %173 : vector<1x32xf32>
    %175 = vector.broadcast %171 : vector<1x32xf32> to vector<8x32xf32>
    %176 = arith.mulf %155, %175 : vector<8x32xf32>
    %177 = vector.broadcast %174 : vector<1x32xf32> to vector<8x32xf32>
    %178 = arith.addf %176, %177 : vector<8x32xf32>
    %cst_133 = arith.constant 0.000000e+00 : f32
    %179 = vector.broadcast %cst_133 : f32 to vector<8x32xf32>
    %180 = arith.maximumf %178, %179 : vector<8x32xf32>
    %c0_134 = arith.constant 0 : index
    %c0_135 = arith.constant 0 : index
    %181 = vector.load %arg18[%c0_134, %c0_135] : memref<8x32xf32, #tpu.memory_space<vmem>>, vector<8x32xf32>
    tpu.vector_store %arg18[%c0_134, %c0_135], %180 {strides = array<i32>} : memref<8x32xf32, #tpu.memory_space<vmem>>, vector<8x32xf32>,
    return
  }
  func.func @transform_0(%arg0: i32) -> (i32, i32) {
    %c0_i32 = arith.constant 0 : i32
    %c0_i32_0 = arith.constant 0 : i32
    %c0_i32_1 = arith.constant 0 : i32
    return %c0_i32, %c0_i32_0 : i32, i32
  }
  func.func @transform_1(%arg0: i32) -> (i32, i32, i32) {
    %c0_i32 = arith.constant 0 : i32
    %c0_i32_0 = arith.constant 0 : i32
    %c0_i32_1 = arith.constant 0 : i32
    %c0_i32_2 = arith.constant 0 : i32
    return %c0_i32, %c0_i32_0, %c0_i32_1 : i32, i32, i32
  }
  func.func @transform_2(%arg0: i32) -> (i32, i32, i32) {
    %c0_i32 = arith.constant 0 : i32
    %c0_i32_0 = arith.constant 0 : i32
    %c0_i32_1 = arith.constant 0 : i32
    %c0_i32_2 = arith.constant 0 : i32
    return %c0_i32, %c0_i32_0, %c0_i32_1 : i32, i32, i32
  }
  func.func @transform_3(%arg0: i32) -> (i32, i32) {
    %c0_i32 = arith.constant 0 : i32
    %c0_i32_0 = arith.constant 0 : i32
    %c0_i32_1 = arith.constant 0 : i32
    return %c0_i32, %c0_i32_0 : i32, i32
  }
  func.func @transform_4(%arg0: i32) -> (i32, i32) {
    %c0_i32 = arith.constant 0 : i32
    %c0_i32_0 = arith.constant 0 : i32
    %c0_i32_1 = arith.constant 0 : i32
    return %c0_i32, %c0_i32_0 : i32, i32
  }
  func.func @transform_5(%arg0: i32) -> (i32, i32, i32) {
    %c0_i32 = arith.constant 0 : i32
    %c0_i32_0 = arith.constant 0 : i32
    %c0_i32_1 = arith.constant 0 : i32
    %c0_i32_2 = arith.constant 0 : i32
    return %c0_i32, %c0_i32_0, %c0_i32_1 : i32, i32, i32
  }
  func.func @transform_6(%arg0: i32) -> (i32, i32, i32) {
    %c0_i32 = arith.constant 0 : i32
    %c0_i32_0 = arith.constant 0 : i32
    %c0_i32_1 = arith.constant 0 : i32
    %c0_i32_2 = arith.constant 0 : i32
    return %c0_i32, %c0_i32_0, %c0_i32_1 : i32, i32, i32
  }
  func.func @transform_7(%arg0: i32) -> (i32, i32) {
    %c0_i32 = arith.constant 0 : i32
    %c0_i32_0 = arith.constant 0 : i32
    %c0_i32_1 = arith.constant 0 : i32
    return %c0_i32, %c0_i32_0 : i32, i32
  }
  func.func @transform_8(%arg0: i32) -> (i32, i32) {
    %c0_i32 = arith.constant 0 : i32
    %c0_i32_0 = arith.constant 0 : i32
    %c0_i32_1 = arith.constant 0 : i32
    return %c0_i32, %c0_i32_0 : i32, i32
  }
  func.func @transform_9(%arg0: i32) -> (i32, i32, i32) {
    %c0_i32 = arith.constant 0 : i32
    %c0_i32_0 = arith.constant 0 : i32
    %c0_i32_1 = arith.constant 0 : i32
    %c0_i32_2 = arith.constant 0 : i32
    return %c0_i32, %c0_i32_0, %c0_i32_1 : i32, i32, i32
  }
  func.func @transform_10(%arg0: i32) -> (i32, i32, i32) {
    %c0_i32 = arith.constant 0 : i32
    %c0_i32_0 = arith.constant 0 : i32
    %c0_i32_1 = arith.constant 0 : i32
    %c0_i32_2 = arith.constant 0 : i32
    return %c0_i32, %c0_i32_0, %c0_i32_1 : i32, i32, i32
  }
  func.func @transform_11(%arg0: i32) -> (i32, i32) {
    %c0_i32 = arith.constant 0 : i32
    %c0_i32_0 = arith.constant 0 : i32
    %c0_i32_1 = arith.constant 0 : i32
    return %c0_i32, %c0_i32_0 : i32, i32
  }
  func.func @transform_12(%arg0: i32) -> (i32, i32) {
    %c0_i32 = arith.constant 0 : i32
    %c0_i32_0 = arith.constant 0 : i32
    %c0_i32_1 = arith.constant 0 : i32
    return %c0_i32, %c0_i32_0 : i32, i32
  }
  func.func @transform_13(%arg0: i32) -> (i32, i32, i32) {
    %c0_i32 = arith.constant 0 : i32
    %c0_i32_0 = arith.constant 0 : i32
    %c0_i32_1 = arith.constant 0 : i32
    %c0_i32_2 = arith.constant 0 : i32
    return %c0_i32, %c0_i32_0, %c0_i32_1 : i32, i32, i32
  }
  func.func @transform_14(%arg0: i32) -> (i32, i32, i32) {
    %c0_i32 = arith.constant 0 : i32
    %c0_i32_0 = arith.constant 0 : i32
    %c0_i32_1 = arith.constant 0 : i32
    %c0_i32_2 = arith.constant 0 : i32
    return %c0_i32, %c0_i32_0, %c0_i32_1 : i32, i32, i32
  }
  func.func @transform_15(%arg0: i32) -> (i32, i32) {
    %c0_i32 = arith.constant 0 : i32
    %c0_i32_0 = arith.constant 0 : i32
    %c0_i32_1 = arith.constant 0 : i32
    return %c0_i32, %c0_i32_0 : i32, i32
  }
  func.func @transform_16(%arg0: i32) -> (i32, i32) {
    %c0_i32 = arith.constant 0 : i32
    %c0_i32_0 = arith.constant 0 : i32
    %c0_i32_1 = arith.constant 0 : i32
    return %c0_i32, %c0_i32_0 : i32, i32
  }
  func.func @transform_17(%arg0: i32) -> (i32, i32) {
    %c0_i32 = arith.constant 0 : i32
    %c0_i32_0 = arith.constant 0 : i32
    %c0_i32_1 = arith.constant 0 : i32
    return %c0_i32, %c0_i32_0 : i32, i32
  }
}

</mosaic_0001>

<bundles_post_ra>
// kernel: tpu_custom_call.1
= control target key start
LH: loop header
LB: loop body
LE: loop exit
PB: predicated region body
PF: predicated region fallthrough
CT: control target
= control target key end

     0   :  { %s3456_s0 = inlined_call_operand.vmem [shape: f32[32,4], index: 0, kind: input, shape index: {}]   ;;  %s3457_s1 = inlined_call_operand.hbm [shape: f32[3,16,32], index: 1, kind: input, shape index: {}]   ;;  %s3458_s2 = inlined_call_operand.hbm [shape: f32[3,4,16], index: 2, kind: input, shape index: {}]   ;;  %s3459_s3 = inlined_call_operand.vmem [shape: f32[1,16], index: 3, kind: input, shape index: {}]   ;;  %s3460_s4 = inlined_call_operand.hbm [shape: f32[1,16], index: 4, kind: input, shape index: {}]   ;;  %s3461_s5 = inlined_call_operand.vmem [shape: f32[3,16,16], index: 5, kind: input, shape index: {}]   ;;  %s3462_s6 = inlined_call_operand.hbm [shape: f32[3,16,16], index: 6, kind: input, shape index: {}]   ;;  %s3463_s7 = inlined_call_operand.hbm [shape: f32[1,16], index: 7, kind: input, shape index: {}]   ;;  %s3464_s8 = inlined_call_operand.hbm [shape: f32[1,16], index: 8, kind: input, shape index: {}]   ;;  %s3465_s9 = inlined_call_operand.hbm [shape: f32[3,16,16], index: 9, kind: input, shape index: {}]   ;;  %s3466_s10 = inlined_call_operand.hbm [shape: f32[3,16,32], index: 10, kind: input, shape index: {}]   ;;  %s3467_s11 = inlined_call_operand.vmem [shape: f32[1,32], index: 11, kind: input, shape index: {}]   ;;  %s3468_s12 = inlined_call_operand.vmem [shape: f32[1,32], index: 12, kind: input, shape index: {}]   ;;  %s3469_s13 = inlined_call_operand.vmem [shape: f32[3,8,16], index: 13, kind: input, shape index: {}]   ;;  %s3470_s14 = inlined_call_operand.hbm [shape: f32[3,32,32], index: 14, kind: input, shape index: {}]   ;;  %s3471_s15 = inlined_call_operand.vmem [shape: f32[1,32], index: 15, kind: input, shape index: {}]   ;;  %s3472_s16 = inlined_call_operand.vmem [shape: f32[1,32], index: 16, kind: input, shape index: {}]   ;;  %s3473_s17 = inlined_call_operand.hbm [shape: f32[8,32], index: 17, kind: output, shape index: {}]  }
   0x1   :  { %3477 = sst [smem:[#allocation24_spill]] %s3456_s0 }
   0x2   :  { %3478 = sst [smem:[#allocation25_spill]] %s3457_s1 }
   0x3   :  { %3479 = sst [smem:[#allocation26_spill]] %s3473_s17 }
   0x4   :  { %22 = vsyncpa [#allocation3], 0 }
   0x5   :  { %23 = vsyncpa [#allocation6], 0 }
   0x6   :  { %24 = vsyncpa [#allocation9], 0 }
   0x7   :  { %25 = vsyncpa [#allocation12], 0 }
   0x8   :  { %26 = vsyncpa [#allocation15], 0 }
   0x9   :  { %27 = vsyncpa [#allocation4], 0  ;;  %s3072_s24 = smov [#allocation5]   ;;  %s2840_s28 = scalar_lea.hbm %s3458_s2, 192 }
   0xa   :  { %s47_s25 = sshll.u32 %s3072_s24, 4  ;;  %p2841_p0 = scmp.ne.s32.totalorder %s3458_s2, %s2840_s28  ;;  %s48_s25 = int_to_ptr.vmem [resolvable:$true] %s47_s25 }
   0xb   :  { %p2844_p1 = scmp.lt.u32.totalorder %s2840_s28, %s3458_s2 }
   0xd   :  { %p2846_p2 = pnand %p2844_p1, %p2841_p0 }
   0xf   :  { %2849 = shalt.err (!%p2846_p2)
}
  0x10   :  { %s2850_s19 = scalar_lea.vmem %s48_s25, 192  ;;  %p2855_p4 = scmp.lt.s32.totalorder %s48_s25, %s48_s25 }
  0x11   :  { %p2851_p3 = scmp.ne.s32.totalorder %s48_s25, %s2850_s19  ;;  %p2856_p5 = scmp.lt.s32.totalorder %s2850_s19, %s2850_s19 }
  0x13   :  { %p2857_p6 = por %p2856_p5, %p2855_p4 }
  0x15   :  { %p2858_p7 = pnand %p2857_p6, %p2851_p3 }
  0x17   :  { %2861 = shalt.err (!%p2858_p7)
}
  0x18   :  { %s3073_s1 = smov 64   ;;  %s3074_s20 = smov 4  }
  0x19   :  { %53 = dma.hbm_to_vmem [thread:$0]  %s3458_s2, 192, %s48_s25, [#allocation6], %s3073_s1, %s3073_s1, %s3074_s20  }
  0x1a   :  { %s3075_s23 = smov [#allocation8]   ;;  %s3076_s26 = smov [#allocation11]  }
  0x1b   :  { %s73_s24 = sshll.u32 %s3075_s23, 4  ;;  %s96_s27 = sshll.u32 %s3076_s26, 4  ;;  %s74_s24 = int_to_ptr.vmem [resolvable:$true] %s73_s24  ;;  %s97_s27 = int_to_ptr.vmem [resolvable:$true] %s96_s27 }
  0x1c   :  { %s2862_s0 = scalar_lea.hbm %s3462_s6, 768 }
  0x1d   :  { %p2863_p8 = scmp.ne.s32.totalorder %s3462_s6, %s2862_s0  ;;  %p2866_p9 = scmp.lt.u32.totalorder %s2862_s0, %s3462_s6 }
  0x1f   :  { %p2868_p10 = pnand %p2866_p9, %p2863_p8 }
  0x21   :  { %2871 = shalt.err (!%p2868_p10)
}
  0x22   :  { %s2872_s2 = scalar_lea.vmem %s74_s24, 768  ;;  %p2877_p12 = scmp.lt.s32.totalorder %s74_s24, %s74_s24 }
  0x23   :  { %p2873_p11 = scmp.ne.s32.totalorder %s74_s24, %s2872_s2  ;;  %p2878_p13 = scmp.lt.s32.totalorder %s2872_s2, %s2872_s2 }
  0x25   :  { %p2879_p0 = por %p2878_p13, %p2877_p12 }
  0x27   :  { %p2880_p1 = pnand %p2879_p0, %p2873_p11 }
  0x29   :  { %2883 = shalt.err (!%p2880_p1)
}
  0x2a   :  { %s3077_s25 = smov 128   ;;  %s3078_s1 = smov 8  }
  0x2b   :  { %79 = dma.hbm_to_vmem [thread:$0]  %s3462_s6, 768, %s74_s24, [#allocation9], %s3077_s25, %s3077_s25, %s3078_s1  }
  0x2c   :  { %s2884_s23 = scalar_lea.hbm %s3464_s8, 16 }
  0x2d   :  { %p2885_p2 = scmp.ne.s32.totalorder %s3464_s8, %s2884_s23  ;;  %p2888_p3 = scmp.lt.u32.totalorder %s2884_s23, %s3464_s8 }
  0x2f   :  { %p2890_p4 = pnand %p2888_p3, %p2885_p2 }
  0x31   :  { %2893 = shalt.err (!%p2890_p4)
}
  0x32   :  { %s2894_s30 = scalar_lea.vmem %s97_s27, 16  ;;  %s2898_s18 = scalar_lea.vmem %s97_s27, 32 }
  0x33   :  { %p2895_p5 = scmp.ne.s32.totalorder %s97_s27, %s2894_s30  ;;  %p2899_p6 = scmp.lt.s32.totalorder %s97_s27, %s97_s27 }
  0x34   :  { %p2900_p7 = scmp.lt.s32.totalorder %s2898_s18, %s2894_s30 }
  0x36   :  { %p2901_p8 = por %p2900_p7, %p2899_p6 }
  0x38   :  { %p2902_p9 = pnand %p2901_p8, %p2895_p5 }
  0x3a   :  { %2905 = shalt.err (!%p2902_p9)
}
  0x3b   :  { %99 = dma.hbm_to_vmem [thread:$0]  %s3464_s8, 16, %s97_s27, [#allocation12]  }
  0x3c   :  { %s3079_s19 = smov [#allocation14]   ;;  %s3080_s20 = smov [#allocation2]  }
  0x3d   :  { %s117_s2 = sshll.u32 %s3079_s19, 4  ;;  %s35_s21 = sshll.u32 %s3080_s20, 4  ;;  %s118_s2 = int_to_ptr.vmem [resolvable:$true] %s117_s2  ;;  %s36_s21 = int_to_ptr.vmem [resolvable:$true] %s35_s21 }
  0x3e   :  { %s2906_s23 = scalar_lea.hbm %s3466_s10, 768 }
  0x3f   :  { %p2907_p10 = scmp.ne.s32.totalorder %s3466_s10, %s2906_s23  ;;  %p2910_p11 = scmp.lt.u32.totalorder %s2906_s23, %s3466_s10 }
  0x41   :  { %p2912_p12 = pnand %p2910_p11, %p2907_p10 }
  0x43   :  { %2915 = shalt.err (!%p2912_p12)
}
  0x44   :  { %s2916_s8 = scalar_lea.vmem %s118_s2, 768  ;;  %p2921_p0 = scmp.lt.s32.totalorder %s118_s2, %s118_s2 }
  0x45   :  { %p2917_p13 = scmp.ne.s32.totalorder %s118_s2, %s2916_s8  ;;  %p2922_p1 = scmp.lt.s32.totalorder %s2916_s8, %s2916_s8 }
  0x47   :  { %p2923_p2 = por %p2922_p1, %p2921_p0 }
  0x49   :  { %p2924_p3 = pnand %p2923_p2, %p2917_p13 }
  0x4b   :  { %2927 = shalt.err (!%p2924_p3)
}
  0x4c   :  { %123 = dma.hbm_to_vmem [thread:$0]  %s3466_s10, 768, %s118_s2, [#allocation15], %s3077_s25, %s3077_s25, %s3078_s1  }
  0x4d   :  { %s3480_s24 = sld [smem:[#allocation25_spill]] }
  0x53   :  { %s2928_s19 = scalar_lea.hbm %s3480_s24, 768 }
  0x54   :  { %p2929_p4 = scmp.ne.s32.totalorder %s3480_s24, %s2928_s19  ;;  %p2932_p5 = scmp.lt.u32.totalorder %s2928_s19, %s3480_s24 }
  0x56   :  { %p2934_p6 = pnand %p2932_p5, %p2929_p4 }
  0x58   :  { %2937 = shalt.err (!%p2934_p6)
}
  0x59   :  { %s2938_s26 = scalar_lea.vmem %s36_s21, 768  ;;  %p2943_p8 = scmp.lt.s32.totalorder %s36_s21, %s36_s21 }
  0x5a   :  { %p2939_p7 = scmp.ne.s32.totalorder %s36_s21, %s2938_s26  ;;  %p2944_p9 = scmp.lt.s32.totalorder %s2938_s26, %s2938_s26 }
  0x5c   :  { %p2945_p10 = por %p2944_p9, %p2943_p8 }
  0x5e   :  { %p2946_p11 = pnand %p2945_p10, %p2939_p7 }
  0x60   :  { %2949 = shalt.err (!%p2946_p11)
}
  0x61   :  { %41 = dma.hbm_to_vmem [thread:$0]  %s3480_s24, 768, %s36_s21, [#allocation3], %s3077_s25, %s3077_s25, %s3078_s1  }
  0x62   :  { %s3081_s28 = smov [#allocation7]   ;;  %s3082_s0 = smov [#allocation10]  }
  0x63   :  { %s62_s29 = sshll.u32 %s3081_s28, 4  ;;  %s86_s8 = sshll.u32 %s3082_s0, 4  ;;  %s63_s29 = int_to_ptr.vmem [resolvable:$true] %s62_s29  ;;  %s87_s8 = int_to_ptr.vmem [resolvable:$true] %s86_s8 }
  0x64   :  { %s2950_s18 = scalar_lea.hbm %s3460_s4, 16 }
  0x65   :  { %p2951_p12 = scmp.ne.s32.totalorder %s3460_s4, %s2950_s18  ;;  %p2954_p13 = scmp.lt.u32.totalorder %s2950_s18, %s3460_s4 }
  0x67   :  { %p2956_p0 = pnand %p2954_p13, %p2951_p12 }
  0x69   :  { %2959 = shalt.err (!%p2956_p0)
}
  0x6a   :  { %s2960_s21 = scalar_lea.vmem %s63_s29, 16  ;;  %s2964_s24 = scalar_lea.vmem %s63_s29, 32 }
  0x6b   :  { %p2961_p1 = scmp.ne.s32.totalorder %s63_s29, %s2960_s21  ;;  %p2965_p2 = scmp.lt.s32.totalorder %s63_s29, %s63_s29 }
  0x6c   :  { %p2966_p3 = scmp.lt.s32.totalorder %s2964_s24, %s2960_s21 }
  0x6e   :  { %p2967_p4 = por %p2966_p3, %p2965_p2 }
  0x70   :  { %p2968_p5 = pnand %p2967_p4, %p2961_p1 }
  0x72   :  { %2971 = shalt.err (!%p2968_p5)
}
  0x73   :  { %65 = dma.hbm_to_vmem [thread:$0]  %s3460_s4, 16, %s63_s29, [#allocation6]  }
  0x74   :  { %s2972_s2 = scalar_lea.hbm %s3463_s7, 16 }
  0x75   :  { %p2973_p6 = scmp.ne.s32.totalorder %s3463_s7, %s2972_s2  ;;  %p2976_p7 = scmp.lt.u32.totalorder %s2972_s2, %s3463_s7 }
  0x77   :  { %p2978_p8 = pnand %p2976_p7, %p2973_p6 }
  0x79   :  { %2981 = shalt.err (!%p2978_p8)
}
  0x7a   :  { %s2982_s18 = scalar_lea.vmem %s87_s8, 16  ;;  %s2986_s6 = scalar_lea.vmem %s87_s8, 32 }
  0x7b   :  { %p2983_p9 = scmp.ne.s32.totalorder %s87_s8, %s2982_s18  ;;  %p2987_p10 = scmp.lt.s32.totalorder %s87_s8, %s87_s8 }
  0x7c   :  { %p2988_p11 = scmp.lt.s32.totalorder %s2986_s6, %s2982_s18 }
  0x7e   :  { %p2989_p12 = por %p2988_p11, %p2987_p10 }
  0x80   :  { %p2990_p13 = pnand %p2989_p12, %p2983_p9 }
  0x82   :  { %2993 = shalt.err (!%p2990_p13)
}
  0x83   :  { %89 = dma.hbm_to_vmem [thread:$0]  %s3463_s7, 16, %s87_s8, [#allocation9]  }
  0x84   :  { %s3083_s19 = smov [#allocation13]   ;;  %s3084_s17 = smov [#allocation16]  }
  0x85   :  { %s105_s20 = sshll.u32 %s3083_s19, 4  ;;  %s135_s21 = sshll.u32 %s3084_s17, 4  ;;  %s106_s20 = int_to_ptr.vmem [resolvable:$true] %s105_s20  ;;  %s136_s21 = int_to_ptr.vmem [resolvable:$true] %s135_s21 }
  0x86   :  { %s2994_s23 = scalar_lea.hbm %s3465_s9, 768 }
  0x87   :  { %p2995_p0 = scmp.ne.s32.totalorder %s3465_s9, %s2994_s23  ;;  %p2998_p1 = scmp.lt.u32.totalorder %s2994_s23, %s3465_s9 }
  0x89   :  { %p3000_p2 = pnand %p2998_p1, %p2995_p0 }
  0x8b   :  { %3003 = shalt.err (!%p3000_p2)
}
  0x8c   :  { %s3004_s7 = scalar_lea.vmem %s106_s20, 768  ;;  %p3009_p4 = scmp.lt.s32.totalorder %s106_s20, %s106_s20 }
  0x8d   :  { %p3005_p3 = scmp.ne.s32.totalorder %s106_s20, %s3004_s7  ;;  %p3010_p5 = scmp.lt.s32.totalorder %s3004_s7, %s3004_s7 }
  0x8f   :  { %p3011_p6 = por %p3010_p5, %p3009_p4 }
  0x91   :  { %p3012_p7 = pnand %p3011_p6, %p3005_p3 }
  0x93   :  { %3015 = shalt.err (!%p3012_p7)
}
  0x94   :  { %111 = dma.hbm_to_vmem [thread:$0]  %s3465_s9, 768, %s106_s20, [#allocation12], %s3077_s25, %s3077_s25, %s3078_s1  }
  0x95   :  { %s3016_s18 = scalar_lea.hbm %s3470_s14, 1536 }
  0x96   :  { %p3017_p8 = scmp.ne.s32.totalorder %s3470_s14, %s3016_s18  ;;  %p3020_p9 = scmp.lt.u32.totalorder %s3016_s18, %s3470_s14 }
  0x98   :  { %p3022_p10 = pnand %p3020_p9, %p3017_p8 }
  0x9a   :  { %3025 = shalt.err (!%p3022_p10)
}
  0x9b   :  { %s3026_s17 = scalar_lea.vmem %s136_s21, 1536  ;;  %p3031_p12 = scmp.lt.s32.totalorder %s136_s21, %s136_s21 }
  0x9c   :  { %p3027_p11 = scmp.ne.s32.totalorder %s136_s21, %s3026_s17  ;;  %p3032_p13 = scmp.lt.s32.totalorder %s3026_s17, %s3026_s17 }
  0x9e   :  { %p3033_p0 = por %p3032_p13, %p3031_p12 }
  0xa0   :  { %p3034_p1 = pnand %p3033_p0, %p3027_p11 }
  0xa2   :  { %3037 = shalt.err (!%p3034_p1)
}
  0xa3   :  { %141 = dma.hbm_to_vmem [thread:$0]  %s3470_s14, 1536, %s136_s21, [#allocation15], %s3077_s25, %s3077_s25, %s3078_s1  }
  0xa4   :  { %3060 = dma.done.wait [#allocation3], 768  }
  0xa5   :  { %3061 = vsyncadd [#allocation3], 4294966528 }
  0xa6   :  { %3062 = dma.done.wait [#allocation6], 208  }
  0xa7   :  { %3063 = vsyncadd [#allocation6], 4294967088 }
  0xa8   :  { %3064 = dma.done.wait [#allocation9], 784  }
  0xa9   :  { %3065 = vsyncadd [#allocation9], 4294966512 }
  0xaa   :  { %3066 = dma.done.wait [#allocation12], 784  }
  0xab   :  { %3067 = vsyncadd [#allocation12], 4294966512 }
  0xac   :  { %3068 = dma.done.wait [#allocation15], 2304  }
  0xad   :  { %3069 = vsyncadd [#allocation15], 4294964992  ;;  %vm179_vm0 = vcmask 261120   ;;  %s3481_s23 = sld [smem:[#allocation24_spill]]  ;;  %v177_v5 = vld [vmem:[#allocation2] sm:$0xff]  ;;  %v178_v8 = vld [vmem:[#allocation2 + $0x8] sm:$0xff]  ;;  %v723_v50 = vlaneseq }
  0xae   :  { %2522 = vmatprep.mubr.msk.f32.mxu0 %vm179_vm0, %v177_v5  ;;  %v519_v7 = vld [vmem:[#allocation2 + $0x20] sm:$0xff]  ;;  %v520_v9 = vld [vmem:[#allocation2 + $0x28] sm:$0xff]  ;;  %v263_v10 = vld [vmem:[#allocation2 + $0x10] sm:$0xff]  ;;  %vm355_vm1 = vcmask 1043456   ;;  %vm348_vm2 = vcmask 31744   ;;  %vm690_vm3 = vcmask 130048  }
  0xaf   :  { %2554 = vmatprep.mubr.msk.f32.mxu1 %vm179_vm0, %v519_v7  ;;  %v264_v11 = vld [vmem:[#allocation2 + $0x18] sm:$0xff]  ;;  %v347_v12 = vld [vmem:[#allocation5 + $0x4] sm:$0xf]  ;;  %v261_v13 = vld [vmem:[#allocation5] sm:$0xf]  ;;  %v724_v51 = vshrl.u32 %v723_v50, 7 }
  0xb0   :  { %v603_v20 = vld [vmem:[#allocation5 + $0x8] sm:$0xf]  ;;  %v2381_v21 = vld [vmem:[%s3461_s5 + $0x10] sm:$0xff]  ;;  %v719_v56 = vld [vmem:[#allocation7] sm:$0x1]  ;;  %vm3086_vm4 = vmmov 0  }
  0xb1   :  { %v740_v22 = vld [vmem:[%s3461_s5] sm:$0xff]  ;;  %v3341_v53 = vsub.s32 0, %v724_v51  ;;  %v2382_v7 = vld [vmem:[%s3461_s5 + $0x18] sm:$0xff]  ;;  %v1268_v51 = vld [vmem:[#allocation10] sm:$0x1]  ;;  %s3088_s21 = smov [#allocation17]  }
  0xb2   :  { %v715_v52 = vld [vmem:[%s3459_s3] sm:$0x1]  ;;  %s2351_s2 = sshll.u32 %s3088_s21, 4  ;;  %s2352_s2 = int_to_ptr.vmem [resolvable:$true] %s2351_s2 }
  0xb3   :  { %v173_v0 = vld [vmem:[%s3481_s23] sm:$0xff]  ;;  %v174_v1 = vld [vmem:[%s3481_s23 + $0x8] sm:$0xff]  ;;  %v175_v2 = vld [vmem:[%s3481_s23 + $0x10] sm:$0xff]  ;;  %p3043_p3 = scmp.lt.s32.totalorder %s2352_s2, %s2352_s2 }
  0xb4   :  { %v2700_v3 = vpack.c.bf16 %v174_v1, %v173_v0  ;;  %v176_v4 = vld [vmem:[%s3481_s23 + $0x18] sm:$0xff] }
  0xb5   :  { %v2704_v6 = vpack.c.bf16 %v176_v4, %v175_v2  ;;  %v910_v1 = vld [vmem:[#allocation8 + $0x10] sm:$0xff]  ;;  %v911_v2 = vld [vmem:[#allocation8 + $0x18] sm:$0xff] }
  0xb6   :  { %2701 = vmatprep.subr.bf16.mxu0 %v2700_v3  ;;  %2717 = vmatprep.subr.bf16.mxu1 %v2700_v3 }
  0xb7   :  { %2703 = vmatpush3.bf16.msra.mxu0 %v2700_v3  ;;  %2719 = vmatpush3.bf16.msra.mxu1 %v2700_v3 }
  0xb8   :  { %2705 = vmatprep.subr.bf16.mxu0 %v2704_v6  ;;  %2721 = vmatprep.subr.bf16.mxu1 %v2704_v6 }
  0xbb   :  { %2707 = vmatpush3.bf16.msra.mxu0 %v2704_v6  ;;  %2723 = vmatpush3.bf16.msra.mxu1 %v2704_v6 }
  0xbc   :  { %2709 = vmatprep.subr.bf16.mxu0 %v2700_v3 }
  0xbe   :  { %2523 = vmatmul.mubr.msk.f32.vlgmr.msra.gmra.mrb[0].mxu0 %vm179_vm0, %v178_v8  ;;  %2555 = vmatmul.mubr.msk.f32.vlgmr.msra.gmra.mrb[0].mxu1 %vm179_vm0, %v520_v9  ;;  %v741_v8 = vld [vmem:[%s3461_s5 + $0x8] sm:$0xff]  ;;  %v2389_v9 = vld [vmem:[%s3461_s5 + $0x20] sm:$0xff] }
  0xbf   :  { %2711 = vmatpush3.bf16.msra.mxu0 %v2700_v3  ;;  %2533 = vmatprep.mubr.msk.f32.mxu0 %vm179_vm0, %v263_v10  ;;  %v2390_v10 = vld [vmem:[%s3461_s5 + $0x28] sm:$0xff] }
  0xc0   :  { %2713 = vmatprep.subr.bf16.mxu0 %v2704_v6  ;;  %2566 = vmatprep.mubr.msk.f32.mxu1 %vm690_vm3, %v740_v22 }
  0xc3   :  { %2715 = vmatpush3.bf16.msra.mxu0 %v2704_v6  ;;  %v2732_v6 = vpack.c.bf16 %v911_v2, %v910_v1 }
  0xc4   :  { %2536 = vmatprep.subr.msk.mxu0 %vm355_vm1, %v347_v12 }
  0xc6   :  { %2534 = vmatmul.mubr.msk.f32.vlgmr.msra.gmra.mrb[2].mxu0 %vm179_vm0, %v264_v11  ;;  %v823_v11 = vld [vmem:[#allocation8] sm:$0xff] }
  0xc7   :  { %2537 = vmatpush3.msk.msra.mxu0 %vm355_vm1, %v347_v12  ;;  %v824_v12 = vld [vmem:[#allocation8 + $0x8] sm:$0xff] }
  0xc8   :  { %2541 = vmatprep.subr.msk.mxu0 %vm355_vm1, %v261_v13 }
 0x191   :  { %v2524_v14 = vpop.f32.mrb[0].mxu0  ;;  %v2556_v15 = vpop.f32.mrb[0].mxu1 }
 0x192   :  { %v252_v16 = vpop.f32.mrb[1].mxu0  ;;  %v593_v17 = vpop.f32.mrb[1].mxu1 }
 0x199   :  { %v2535_v18 = vpop.f32.mrb[2].mxu0 }
 0x19a   :  { %v337_v19 = vpop.f32.mrb[3].mxu0 }
 0x19b   :  { %2538 = vmatprep.mubr.msk.f32.mxu0 %vm348_vm2, %v337_v19 }
 0x19c   :  { %2539 = vmatmul.mubr.msk.f32.vlgmr.msra.gmra.mrb[4].mxu0 %vm348_vm2, %v2535_v18 }
 0x19d   :  { %2542 = vmatpush3.msk.msra.mxu0 %vm355_vm1, %v261_v13  ;;  %2543 = vmatprep.mubr.msk.f32.mxu0 %vm348_vm2, %v252_v16  ;;  %v2736_v13 = vpack.c.bf16 %v824_v12, %v823_v11  ;;  %v1376_v11 = vld [vmem:[#allocation14] sm:$0xff]  ;;  %v1377_v12 = vld [vmem:[#allocation14 + $0x8] sm:$0xff] }
 0x19e   :  { %2557 = vmatprep.subr.msk.mxu0 %vm355_vm1, %v603_v20 }
 0x1a4   :  { %2544 = vmatmul.mubr.msk.f32.vlgmr.msra.gmra.mrb[4].mxu0 %vm348_vm2, %v2524_v14  ;;  %v1159_v14 = vld [vmem:[#allocation8 + $0x20] sm:$0xff] }
 0x1a5   :  { %2558 = vmatpush3.msk.msra.mxu0 %vm355_vm1, %v603_v20  ;;  %2559 = vmatprep.mubr.msk.f32.mxu0 %vm348_vm2, %v593_v17 }
 0x1ac   :  { %2560 = vmatmul.mubr.msk.f32.vlgmr.msra.gmra.mrb[4].mxu0 %vm348_vm2, %v2556_v15  ;;  %v1160_v15 = vld [vmem:[#allocation8 + $0x28] sm:$0xff] }
 0x1ad   :  { %2573 = vmatprep.mubr.msk.f32.mxu0 %vm690_vm3, %v2381_v21  ;;  %v2744_v20 = vpack.c.bf16 %v1160_v15, %v1159_v14 }
 0x27f   :  { %v2561_v23 = vpop.f32.mrb[4].mxu0 }
 0x280   :  { %v692_v24 = vsel %vm690_vm3, %v2561_v23, 0.0  ;;  %v679_v25 = vpop.f32.mrb[5].mxu0 }
 0x281   :  { %v691_v26 = vsel %vm690_vm3, %v679_v25, 0.0 }
 0x282   :  { %v693_v27 = vadd.f32 %v692_v24, %v691_v26 }
 0x284   :  { %v694_v28 = vrot.slane %v693_v27, 4 }
 0x286   :  { %v695_v29 = vadd.f32 %v694_v28, %v693_v27 }
 0x288   :  { %v696_v30 = vrot.slane %v695_v29, 2 }
 0x28a   :  { %v697_v31 = vadd.f32 %v696_v30, %v695_v29 }
 0x28c   :  { %v698_v32 = vrot.slane %v697_v31, 1 }
 0x28e   :  { %v699_v33 = vadd.f32 %v698_v32, %v697_v31 }
 0x290   :  { %v700_v34 = vmul.f32 0.0625, %v699_v33 }
 0x292   :  { %v701_v35 = vsub.f32 %v679_v25, %v700_v34  ;;  %v702_v36 = vsub.f32 %v2561_v23, %v700_v34 }
 0x294   :  { %v703_v37 = vmul.f32 %v701_v35, %v701_v35  ;;  %v704_v38 = vmul.f32 %v702_v36, %v702_v36 }
 0x296   :  { %v705_v39 = vsel %vm690_vm3, %v703_v37, 0.0  ;;  %v706_v40 = vsel %vm690_vm3, %v704_v38, 0.0 }
 0x297   :  { %v707_v41 = vadd.f32 %v706_v40, %v705_v39 }
 0x299   :  { %v708_v42 = vrot.slane %v707_v41, 4 }
 0x29b   :  { %v709_v43 = vadd.f32 %v708_v42, %v707_v41 }
 0x29d   :  { %v710_v44 = vrot.slane %v709_v43, 2 }
 0x29f   :  { %v711_v45 = vadd.f32 %v710_v44, %v709_v43 }
 0x2a1   :  { %v712_v46 = vrot.slane %v711_v45, 1 }
 0x2a3   :  { %v713_v47 = vadd.f32 %v712_v46, %v711_v45 }
 0x2a5   :  { %v714_v48 = vmul.f32 0.0625, %v713_v47 }
 0x2a7   :  { %v716_v49 = vadd.f32 1e-05, %v714_v48 }
 0x2a9   :  { %2832 = vrsqrt.f32 %v716_v49 }
 0x2b3   :  { %v2833_v54 = vpop.eup %2832 }
 0x2b4   :  { %v718_v55 = vmul.f32 %v2833_v54, %v715_v52 }
 0x2b6   :  { %v720_v57 = vmul.f32 %v718_v55, %v700_v34  ;;  %v726_v58 = vrot.slane %v718_v55, %v3341_v53  ;;  %v1272_v55 = vld [vmem:[#allocation11] sm:$0x1] }
 0x2b8   :  { %v721_v59 = vsub.f32 %v719_v56, %v720_v57  ;;  %v728_v60 = vmul.f32 %v726_v58, %v679_v25  ;;  %v729_v61 = vmul.f32 %v2561_v23, %v726_v58  ;;  %v1293_v23 = vld [vmem:[#allocation13] sm:$0xff] }
 0x2ba   :  { %v734_v62 = vrot.slane %v721_v59, %v3341_v53 }
 0x2bc   :  { %v736_v63 = vadd.f32 %v734_v62, %v728_v60  ;;  %v737_v0 = vadd.f32 %v734_v62, %v729_v61 }
 0x2be   :  { %v738_v3 = vmax.f32 %v736_v63, 0.0  ;;  %v739_v4 = vmax.f32 %v737_v0, 0.0 }
 0x2c0   :  { %v2724_v5 = vpack.c.bf16 %v739_v4, %v738_v3  ;;  %v1294_v3 = vld [vmem:[#allocation13 + $0x8] sm:$0xff]  ;;  %v1379_v4 = vld [vmem:[#allocation13 + $0x10] sm:$0xff] }
 0x2c2   :  { %2725 = vmatprep.subr.bf16.mxu1 %v2724_v5  ;;  %2729 = vmatprep.subr.bf16.mxu0 %v2724_v5 }
 0x2c3   :  { %2727 = vmatpush3.bf16.msra.mxu1 %v2724_v5  ;;  %2731 = vmatpush3.bf16.msra.mxu0 %v2724_v5 }
 0x2c4   :  { %2741 = vmatprep.subr.bf16.mxu0 %v2724_v5  ;;  %2733 = vmatprep.subr.bf16.mxu1 %v2732_v6 }
 0x2c6   :  { %2574 = vmatmul.mubr.msk.f32.vlgmr.msra.gmra.mrb[6].mxu0 %vm690_vm3, %v2382_v7  ;;  %2567 = vmatmul.mubr.msk.f32.vlgmr.msra.gmra.mrb[2].mxu1 %vm690_vm3, %v741_v8  ;;  %v1629_v7 = vld [vmem:[#allocation13 + $0x28] sm:$0xff]  ;;  %v1463_v8 = vld [vmem:[#allocation14 + $0x10] sm:$0xff] }
 0x2c7   :  { %2743 = vmatpush3.bf16.msra.mxu0 %v2724_v5  ;;  %2594 = vmatprep.mubr.msk.f32.mxu0 %vm690_vm3, %v2389_v9  ;;  %v1380_v5 = vld [vmem:[#allocation13 + $0x18] sm:$0xff]  ;;  %v1464_v9 = vld [vmem:[#allocation14 + $0x18] sm:$0xff] }
 0x2c8   :  { %2735 = vmatpush3.bf16.msra.mxu1 %v2732_v6  ;;  %v1628_v6 = vld [vmem:[#allocation13 + $0x20] sm:$0xff] }
 0x2c9   :  { %2737 = vmatprep.subr.bf16.mxu1 %v2736_v13 }
 0x2ca   :  { %2595 = vmatmul.mubr.msk.f32.vlgmr.msra.gmra.mrb[8].mxu0 %vm690_vm3, %v2390_v10  ;;  %v2756_v10 = vpack.c.bf16 %v1464_v9, %v1463_v8  ;;  %v2408_v8 = vld [vmem:[%s3469_s13 + $0x8] sm:$0xff]  ;;  %v2412_v9 = vld [vmem:[%s3469_s13 + $0x10] sm:$0xff] }
 0x2cb   :  { %2608 = vmatprep.mubr.msk.f32.mxu0 %vm690_vm3, %v1293_v23  ;;  %v3085_v23 = vmov 0.0|0.0  }
 0x399   :  { %v2575_v16 = vpop.f32.mrb[6].mxu0  ;;  %v2568_v17 = vpop.f32.mrb[2].mxu1 }
 0x39a   :  { %v900_v18 = vpop.f32.mrb[7].mxu0  ;;  %v814_v19 = vpop.f32.mrb[3].mxu1 }
 0x39b   :  { %2580 = vmatprep.mubr.msk.f32.mxu1 %vm690_vm3, %v900_v18 }
 0x39c   :  { %2581 = vmatmul.mubr.msk.f32.vlgmr.msra.gmra.mrb[4].mxu1 %vm690_vm3, %v2575_v16  ;;  %v1712_v16 = vld [vmem:[#allocation14 + $0x20] sm:$0xff] }
 0x39d   :  { %2739 = vmatpush3.bf16.msra.mxu1 %v2736_v13  ;;  %2587 = vmatprep.mubr.msk.f32.mxu1 %vm690_vm3, %v814_v19  ;;  %v2596_v21 = vpop.f32.mrb[8].mxu0  ;;  %v2760_v13 = vpack.c.bf16 %v1377_v12, %v1376_v11  ;;  %v2003_v11 = vld [vmem:[#allocation16 + $0x38] sm:$0xff] }
 0x39e   :  { %2745 = vmatprep.subr.bf16.mxu1 %v2744_v20  ;;  %v1149_v22 = vpop.f32.mrb[9].mxu0 }
 0x3a4   :  { %2588 = vmatmul.mubr.msk.f32.vlgmr.msra.gmra.mrb[4].mxu1 %vm690_vm3, %v2568_v17  ;;  %v1713_v17 = vld [vmem:[#allocation14 + $0x28] sm:$0xff] }
 0x3a5   :  { %2747 = vmatpush3.bf16.msra.mxu1 %v2744_v20  ;;  %2601 = vmatprep.mubr.msk.f32.mxu1 %vm690_vm3, %v1149_v22  ;;  %v2768_v20 = vpack.c.bf16 %v1713_v17, %v1712_v16 }
 0x3a6   :  { %2757 = vmatprep.subr.bf16.mxu1 %v2756_v10 }
 0x3ac   :  { %2602 = vmatmul.mubr.msk.f32.vlgmr.msra.gmra.mrb[4].mxu1 %vm690_vm3, %v2596_v21 }
 0x3ad   :  { %2759 = vmatpush3.bf16.msra.mxu1 %v2756_v10  ;;  %v2002_v10 = vld [vmem:[#allocation16 + $0x30] sm:$0xff] }
 0x3ae   :  { %2761 = vmatprep.subr.bf16.mxu1 %v2760_v13  ;;  %v2782_v12 = vpack.c.bf16 %v2003_v11, %v2002_v10 }
 0x47f   :  { %v2603_v24 = vpop.f32.mrb[4].mxu1 }
 0x480   :  { %v1245_v25 = vsel %vm690_vm3, %v2603_v24, 0.0  ;;  %v1233_v26 = vpop.f32.mrb[5].mxu1 }
 0x481   :  { %v1244_v27 = vsel %vm690_vm3, %v1233_v26, 0.0 }
 0x482   :  { %v1246_v28 = vadd.f32 %v1245_v25, %v1244_v27  ;;  %v2000_v25 = vld [vmem:[#allocation16 + $0x20] sm:$0xff] }
 0x484   :  { %v1247_v29 = vrot.slane %v1246_v28, 4 }
 0x486   :  { %v1248_v30 = vadd.f32 %v1247_v29, %v1246_v28 }
 0x488   :  { %v1249_v31 = vrot.slane %v1248_v30, 2 }
 0x48a   :  { %v1250_v32 = vadd.f32 %v1249_v31, %v1248_v30 }
 0x48c   :  { %v1251_v33 = vrot.slane %v1250_v32, 1 }
 0x48e   :  { %v1252_v34 = vadd.f32 %v1251_v33, %v1250_v32 }
 0x490   :  { %v1253_v35 = vmul.f32 0.0625, %v1252_v34 }
 0x492   :  { %v1254_v36 = vsub.f32 %v1233_v26, %v1253_v35  ;;  %v1255_v37 = vsub.f32 %v2603_v24, %v1253_v35 }
 0x494   :  { %v1256_v38 = vmul.f32 %v1254_v36, %v1254_v36  ;;  %v1257_v39 = vmul.f32 %v1255_v37, %v1255_v37 }
 0x496   :  { %v1258_v40 = vsel %vm690_vm3, %v1256_v38, 0.0  ;;  %v1259_v41 = vsel %vm690_vm3, %v1257_v39, 0.0 }
 0x497   :  { %v1260_v42 = vadd.f32 %v1259_v41, %v1258_v40 }
 0x499   :  { %v1261_v43 = vrot.slane %v1260_v42, 4 }
 0x49b   :  { %v1262_v44 = vadd.f32 %v1261_v43, %v1260_v42 }
 0x49d   :  { %v1263_v45 = vrot.slane %v1262_v44, 2 }
 0x49f   :  { %v1264_v46 = vadd.f32 %v1263_v45, %v1262_v44 }
 0x4a1   :  { %v1265_v47 = vrot.slane %v1264_v46, 1 }
 0x4a3   :  { %v1266_v48 = vadd.f32 %v1265_v47, %v1264_v46 }
 0x4a5   :  { %v1267_v49 = vmul.f32 0.0625, %v1266_v48 }
 0x4a7   :  { %v1269_v50 = vadd.f32 1e-05, %v1267_v49 }
 0x4a9   :  { %2834 = vrsqrt.f32 %v1269_v50 }
 0x4b3   :  { %v2835_v52 = vpop.eup %2834 }
 0x4b4   :  { %v1271_v54 = vmul.f32 %v2835_v52, %v1268_v51 }
 0x4b6   :  { %v1273_v56 = vmul.f32 %v1271_v54, %v1253_v35  ;;  %v1279_v57 = vrot.slane %v1271_v54, %v3341_v53 }
 0x4b8   :  { %v1274_v58 = vsub.f32 %v1272_v55, %v1273_v56  ;;  %v1281_v59 = vmul.f32 %v1279_v57, %v1233_v26  ;;  %v1282_v60 = vmul.f32 %v2603_v24, %v1279_v57  ;;  %v3087_v24 = vmov 0.0   ;;  %v2001_v26 = vld [vmem:[#allocation16 + $0x28] sm:$0xff]  ;;  %v1821_v56 = vld [vmem:[%s3467_s11] sm:$0x1] }
 0x4b9   :  { %v2779_v27 = vpack.c.bf16 %v2001_v26, %v2000_v25  ;;  %v2226_v25 = vld [vmem:[#allocation16 + $0x40] sm:$0xff]  ;;  %v2227_v26 = vld [vmem:[#allocation16 + $0x48] sm:$0xff] }
 0x4ba   :  { %v1287_v61 = vrot.slane %v1274_v58, %v3341_v53 }
 0x4bc   :  { %v1289_v62 = vadd.f32 %v1287_v61, %v1281_v59  ;;  %v1290_v63 = vadd.f32 %v1287_v61, %v1282_v60  ;;  %v1825_v59 = vld [vmem:[%s3468_s12] sm:$0x1] }
 0x4be   :  { %v1291_v0 = vmax.f32 %v1289_v62, 0.0  ;;  %v1292_v1 = vmax.f32 %v1290_v63, 0.0 }
 0x4c0   :  { %v2748_v2 = vpack.c.bf16 %v1292_v1, %v1291_v0 }
 0x4c2   :  { %2749 = vmatprep.subr.bf16.mxu0 %v2748_v2 }
 0x4c3   :  { %2751 = vmatpush3.bf16.msra.mxu0 %v2748_v2 }
 0x4c4   :  { %2753 = vmatprep.subr.bf16.mxu0 %v2748_v2 }
 0x4c6   :  { %2609 = vmatmul.mubr.msk.f32.vlgmr.msra.gmra.mrb[10].mxu0 %vm690_vm3, %v1294_v3 }
 0x4c7   :  { %2755 = vmatpush3.bf16.msra.mxu0 %v2748_v2  ;;  %2615 = vmatprep.mubr.msk.f32.mxu0 %vm690_vm3, %v1379_v4 }
 0x4c8   :  { %2765 = vmatprep.subr.bf16.mxu0 %v2748_v2 }
 0x4ca   :  { %2616 = vmatmul.mubr.msk.f32.vlgmr.msra.gmra.mrb[12].mxu0 %vm690_vm3, %v1380_v5 }
 0x4cb   :  { %2767 = vmatpush3.bf16.msra.mxu0 %v2748_v2  ;;  %2636 = vmatprep.mubr.msk.f32.mxu0 %vm690_vm3, %v1628_v6 }
 0x4cc   :  { %2772 = vmatprep.subr.bf16.mxu0 %v3085_v23 }
 0x4ce   :  { %2637 = vmatmul.mubr.msk.f32.vlgmr.msra.gmra.mrb[14].mxu0 %vm690_vm3, %v1629_v7  ;;  %v1846_v7 = vld [vmem:[%s3469_s13] sm:$0xff] }
 0x4cf   :  { %2650 = vmatprep.mubr.msk.f32.mxu0 %vm3086_vm4, %v3087_v24 }
 0x599   :  { %v2610_v14 = vpop.f32.mrb[10].mxu0 }
 0x59a   :  { %v1367_v15 = vpop.f32.mrb[11].mxu0 }
 0x59d   :  { %v2617_v18 = vpop.f32.mrb[12].mxu0 }
 0x59e   :  { %v1453_v19 = vpop.f32.mrb[13].mxu0 }
 0x59f   :  { %2622 = vmatprep.mubr.msk.f32.mxu1 %vm690_vm3, %v1453_v19  ;;  %v1923_v19 = vld [vmem:[#allocation16 + $0x18] sm:$0xff] }
 0x5a0   :  { %2623 = vmatmul.mubr.msk.f32.vlgmr.msra.gmra.mrb[6].mxu1 %vm690_vm3, %v2617_v18  ;;  %v1922_v18 = vld [vmem:[#allocation16 + $0x10] sm:$0xff] }
 0x5a1   :  { %2763 = vmatpush3.bf16.msra.mxu1 %v2760_v13  ;;  %2629 = vmatprep.mubr.msk.f32.mxu1 %vm690_vm3, %v1367_v15  ;;  %v2638_v21 = vpop.f32.mrb[14].mxu0  ;;  %v1920_v13 = vld [vmem:[#allocation16] sm:$0xff] }
 0x5a2   :  { %2769 = vmatprep.subr.bf16.mxu1 %v2768_v20  ;;  %v1702_v22 = vpop.f32.mrb[15].mxu0 }
 0x5a8   :  { %2630 = vmatmul.mubr.msk.f32.vlgmr.msra.gmra.mrb[6].mxu1 %vm690_vm3, %v2610_v14  ;;  %v1921_v14 = vld [vmem:[#allocation16 + $0x8] sm:$0xff] }
 0x5a9   :  { %2771 = vmatpush3.bf16.msra.mxu1 %v2768_v20  ;;  %2643 = vmatprep.mubr.msk.f32.mxu1 %vm690_vm3, %v1702_v22  ;;  %v2785_v17 = vpack.c.bf16 %v1921_v14, %v1920_v13  ;;  %v2788_v22 = vpack.c.bf16 %v1923_v19, %v1922_v18 }
 0x5aa   :  { %2778 = vmatprep.subr.bf16.mxu1 %v3085_v23 }
 0x5b0   :  { %2644 = vmatmul.mubr.msk.f32.vlgmr.msra.gmra.mrb[6].mxu1 %vm690_vm3, %v2638_v21 }
 0x5b1   :  { %2668 = vmatprep.mubr.msk.f32.mxu1 %vm3086_vm4, %v3087_v24  ;;  %2780 = vmatpush3.bf16.msra.mxu1 %v2779_v27 }
 0x5b2   :  { %2781 = vmatprep.subr.bf16.mxu1 %v3085_v23 }
 0x5b5   :  { %2783 = vmatpush3.bf16.msra.mxu1 %v2782_v12 }
 0x5b6   :  { %2784 = vmatprep.subr.bf16.mxu1 %v3085_v23 }
 0x683   :  { %v2645_v28 = vpop.f32.mrb[6].mxu1 }
 0x684   :  { %v1798_v29 = vsel %vm179_vm0, %v2645_v28, 0.0  ;;  %v1786_v30 = vpop.f32.mrb[7].mxu1 }
 0x685   :  { %v1797_v31 = vsel %vm179_vm0, %v1786_v30, 0.0 }
 0x686   :  { %v1799_v32 = vadd.f32 %v1798_v29, %v1797_v31  ;;  %v2794_v29 = vpack.c.bf16 %v2227_v26, %v2226_v25  ;;  %v2229_v31 = vld [vmem:[#allocation16 + $0x58] sm:$0xff] }
 0x688   :  { %v1800_v33 = vrot.slane %v1799_v32, 4 }
 0x68a   :  { %v1801_v34 = vadd.f32 %v1800_v33, %v1799_v32 }
 0x68c   :  { %v1802_v35 = vrot.slane %v1801_v34, 2 }
 0x68e   :  { %v1803_v36 = vadd.f32 %v1802_v35, %v1801_v34 }
 0x690   :  { %v1804_v37 = vrot.slane %v1803_v36, 1 }
 0x692   :  { %v1805_v38 = vadd.f32 %v1804_v37, %v1803_v36 }
 0x694   :  { %v1806_v39 = vmul.f32 0.0625, %v1805_v38 }
 0x696   :  { %v1807_v40 = vsub.f32 %v1786_v30, %v1806_v39  ;;  %v1808_v41 = vsub.f32 %v2645_v28, %v1806_v39 }
 0x698   :  { %v1809_v42 = vmul.f32 %v1807_v40, %v1807_v40  ;;  %v1810_v43 = vmul.f32 %v1808_v41, %v1808_v41 }
 0x69a   :  { %v1811_v44 = vsel %vm179_vm0, %v1809_v42, 0.0  ;;  %v1812_v45 = vsel %vm179_vm0, %v1810_v43, 0.0 }
 0x69b   :  { %v1813_v46 = vadd.f32 %v1812_v45, %v1811_v44 }
 0x69d   :  { %v1814_v47 = vrot.slane %v1813_v46, 4 }
 0x69f   :  { %v1815_v48 = vadd.f32 %v1814_v47, %v1813_v46 }
 0x6a1   :  { %v1816_v49 = vrot.slane %v1815_v48, 2 }
 0x6a3   :  { %v1817_v50 = vadd.f32 %v1816_v49, %v1815_v48 }
 0x6a5   :  { %v1818_v51 = vrot.slane %v1817_v50, 1 }
 0x6a7   :  { %v1819_v52 = vadd.f32 %v1818_v51, %v1817_v50 }
 0x6a9   :  { %v1820_v54 = vmul.f32 0.0625, %v1819_v52  ;;  %v2322_v52 = vld [vmem:[%s3471_s15] sm:$0x1]  ;;  %s3038_s15 = scalar_lea.vmem %s2352_s2, 128 }
 0x6aa   :  { %p3039_p2 = scmp.ne.s32.totalorder %s2352_s2, %s3038_s15  ;;  %p3044_p4 = scmp.lt.s32.totalorder %s3038_s15, %s3038_s15 }
 0x6ab   :  { %v1822_v55 = vadd.f32 1e-05, %v1820_v54 }
 0x6ac   :  { %p3045_p5 = por %p3044_p4, %p3043_p3 }
 0x6ad   :  { %2836 = vrsqrt.f32 %v1822_v55 }
 0x6ae   :  { %p3046_p6 = pnand %p3045_p5, %p3039_p2 }
 0x6b7   :  { %v2837_v57 = vpop.eup %2836 }
 0x6b8   :  { %v1824_v58 = vmul.f32 %v2837_v57, %v1821_v56  ;;  %v2326_v56 = vld [vmem:[%s3472_s16] sm:$0x1] }
 0x6ba   :  { %v1826_v60 = vmul.f32 %v1824_v58, %v1806_v39  ;;  %v1832_v61 = vrot.slane %v1824_v58, %v3341_v53 }
 0x6bc   :  { %v1827_v62 = vsub.f32 %v1825_v59, %v1826_v60  ;;  %v1834_v63 = vmul.f32 %v1832_v61, %v1786_v30  ;;  %v1835_v0 = vmul.f32 %v2645_v28, %v1832_v61  ;;  %v2228_v30 = vld [vmem:[#allocation16 + $0x50] sm:$0xff] }
 0x6bd   :  { %v2797_v32 = vpack.c.bf16 %v2229_v31, %v2228_v30 }
 0x6be   :  { %v1840_v1 = vrot.slane %v1827_v62, %v3341_v53 }
 0x6c0   :  { %v1842_v2 = vadd.f32 %v1840_v1, %v1834_v63  ;;  %v1843_v3 = vadd.f32 %v1840_v1, %v1835_v0 }
 0x6c2   :  { %v1844_v4 = vmax.f32 %v1842_v2, 0.0  ;;  %v1845_v5 = vmax.f32 %v1843_v3, 0.0 }
 0x6c4   :  { %v2773_v6 = vpack.c.bf16 %v1845_v5, %v1844_v4 }
 0x6c6   :  { %2774 = vmatpush3.bf16.msra.mxu0 %v2773_v6 }
 0x6c7   :  { %2775 = vmatprep.subr.bf16.mxu0 %v3085_v23 }
 0x6c9   :  { %2651 = vmatmul.mubr.msk.f32.vlgmr.msra.gmra.mrb[16].mxu0 %vm690_vm3, %v1846_v7 }
 0x6ca   :  { %2777 = vmatpush3.bf16.msra.mxu0 %v2773_v6  ;;  %2657 = vmatprep.mubr.msk.f32.mxu0 %vm3086_vm4, %v3087_v24 }
 0x6cb   :  { %2790 = vmatprep.subr.bf16.mxu0 %v3085_v23 }
 0x6cd   :  { %2658 = vmatmul.mubr.msk.f32.vlgmr.msra.gmra.mrb[18].mxu0 %vm690_vm3, %v2408_v8 }
 0x6ce   :  { %2792 = vmatpush3.bf16.msra.mxu0 %v2773_v6  ;;  %2686 = vmatprep.mubr.msk.f32.mxu0 %vm3086_vm4, %v3087_v24 }
 0x6d1   :  { %2687 = vmatmul.mubr.msk.f32.vlgmr.msra.gmra.mrb[20].mxu0 %vm690_vm3, %v2412_v9 }
 0x79c   :  { %v1916_v15 = vpop.f32.mrb[16].mxu0 }
 0x79d   :  { %v2652_v16 = vpop.f32.mrb[17].mxu0 }
 0x7a0   :  { %v1995_v20 = vpop.f32.mrb[18].mxu0 }
 0x7a1   :  { %v2659_v21 = vpop.f32.mrb[19].mxu0  ;;  %2669 = vmatmul.mubr.msk.f32.vlgmr.msra.gmra.mrb[8].mxu1 %vm179_vm0, %v1995_v20 }
 0x7a2   :  { %2786 = vmatpush3.bf16.msra.mxu1 %v2785_v17  ;;  %2679 = vmatprep.mubr.msk.f32.mxu1 %vm3086_vm4, %v3087_v24 }
 0x7a3   :  { %2787 = vmatprep.subr.bf16.mxu1 %v3085_v23 }
 0x7a4   :  { %v2221_v27 = vpop.f32.mrb[20].mxu0 }
 0x7a5   :  { %v2688_v28 = vpop.f32.mrb[21].mxu0 }
 0x7a6   :  { %2789 = vmatpush3.bf16.msra.mxu1 %v2788_v22 }
 0x7a7   :  { %2793 = vmatprep.subr.bf16.mxu1 %v3085_v23 }
 0x7a9   :  { %2680 = vmatmul.mubr.msk.f32.vlgmr.msra.gmra.mrb[8].mxu1 %vm179_vm0, %v1916_v15 }
 0x7aa   :  { %2795 = vmatpush3.bf16.msra.mxu1 %v2794_v29  ;;  %2697 = vmatprep.mubr.msk.f32.mxu1 %vm3086_vm4, %v3087_v24 }
 0x7ab   :  { %2796 = vmatprep.subr.bf16.mxu1 %v3085_v23 }
 0x7ae   :  { %2798 = vmatpush3.bf16.msra.mxu1 %v2797_v32 }
 0x7b1   :  { %2698 = vmatmul.mubr.msk.f32.vlgmr.msra.gmra.mrb[8].mxu1 %vm179_vm0, %v2221_v27 }
 0x884   :  { %v2299_v33 = vpop.f32.mrb[8].mxu1 }
 0x885   :  { %v2304_v34 = vsel %vm179_vm0, %v2299_v33, 0.0  ;;  %v2699_v35 = vpop.f32.mrb[9].mxu1 }
 0x886   :  { %v2305_v36 = vrot.slane %v2304_v34, 4 }
 0x888   :  { %v2306_v37 = vadd.f32 %v2305_v36, %v2304_v34 }
 0x88a   :  { %v2307_v38 = vrot.slane %v2306_v37, 2 }
 0x88c   :  { %v2308_v39 = vadd.f32 %v2307_v38, %v2306_v37 }
 0x88e   :  { %v2309_v40 = vrot.slane %v2308_v39, 1 }
 0x890   :  { %v2310_v41 = vadd.f32 %v2309_v40, %v2308_v39 }
 0x892   :  { %v2311_v42 = vmul.f32 0.125, %v2310_v41 }
 0x894   :  { %v2312_v43 = vsub.f32 %v2299_v33, %v2311_v42 }
 0x896   :  { %v2313_v44 = vmul.f32 %v2312_v43, %v2312_v43 }
 0x898   :  { %v2314_v24 = vsel %vm179_vm0, %v2313_v44, 0.0 }
 0x899   :  { %v2315_v45 = vrot.slane %v2314_v24, 4 }
 0x89b   :  { %v2316_v23 = vadd.f32 %v2315_v45, %v2314_v24 }
 0x89d   :  { %v2317_v46 = vrot.slane %v2316_v23, 2 }
 0x89f   :  { %v2318_v47 = vadd.f32 %v2317_v46, %v2316_v23 }
 0x8a1   :  { %v2319_v48 = vrot.slane %v2318_v47, 1 }
 0x8a3   :  { %v2320_v49 = vadd.f32 %v2319_v48, %v2318_v47 }
 0x8a5   :  { %v2321_v50 = vmul.f32 0.125, %v2320_v49 }
 0x8a7   :  { %v2323_v51 = vadd.f32 1e-05, %v2321_v50 }
 0x8a9   :  { %2838 = vrsqrt.f32 %v2323_v51 }
 0x8b3   :  { %v2839_v54 = vpop.eup %2838 }
 0x8b4   :  { %v2325_v55 = vmul.f32 %v2839_v54, %v2322_v52 }
 0x8b6   :  { %v2327_v57 = vmul.f32 %v2325_v55, %v2311_v42  ;;  %v2333_v58 = vrot.slane %v2325_v55, %v3341_v53 }
 0x8b8   :  { %v2328_v59 = vsub.f32 %v2326_v56, %v2327_v57  ;;  %v2335_v60 = vmul.f32 %v2333_v58, %v2299_v33 }
 0x8ba   :  { %v2340_v61 = vrot.slane %v2328_v59, %v3341_v53 }
 0x8bc   :  { %v2342_v62 = vadd.f32 %v2340_v61, %v2335_v60 }
 0x8be   :  { %v2343_v63 = vmax.f32 %v2342_v62, 0.0 }
 0x8c0   :  { %2344 = vst.msk [vmem:[#allocation17] sm:$0xff] %vm179_vm0, %v2343_v63 }
 0x8c1   :  { %3049 = shalt.err (!%p3046_p6)
}
 0x8c2   :  { %s3482_s7 = sld [smem:[#allocation26_spill]] }
 0x8c8   :  { %s3050_s8 = scalar_lea.hbm %s3482_s7, 128 }
 0x8c9   :  { %p3051_p7 = scmp.ne.s32.totalorder %s3482_s7, %s3050_s8  ;;  %p3054_p8 = scmp.lt.u32.totalorder %s3050_s8, %s3482_s7 }
 0x8cb   :  { %p3056_p9 = pnand %p3054_p8, %p3051_p7 }
 0x8cd   :  { %3059 = shalt.err (!%p3056_p9)
}
 0x8ce   :  { %2354 = dma.vmem_to_hbm [thread:$0]  %s2352_s2, 128, %s3482_s7, [#allocation4]  }
 0x8cf   :  { %3070 = dma.done.wait [#allocation4], 128  }
 0x8d0   :  { %3071 = vsyncadd [#allocation4], 4294967168 }
 0x8d1   :  { %2358 = vsyncpa [#allocation3], 1 }
 0x8d2   :  { %2359 = vsyncpa [#allocation6], 1 }
 0x8d3   :  { %2360 = vsyncpa [#allocation9], 1 }
 0x8d4   :  { %2361 = vsyncpa [#allocation12], 1 }
 0x8d5   :  { %2362 = vsyncpa [#allocation15], 1 }
 0x8d6   :  { %2363 = vsyncpa [#allocation4], 1 }

</bundles_post_ra>
